<compile_context>
chip_gen: v7x
topology: tpu7x:2x2x1
jax: 0.10.0
libtpu: 0.0.40
codegen_flags: <defaults>
</compile_context>

<pallas_src>
import functools

import jax
import jax.numpy as jnp
from jax import lax
from jax.experimental import pallas as pl
from jax.experimental.pallas import tpu as pltpu


def _r8(n):
    return (n + 7) // 8 * 8


def _pack_offsets(D, H):
    """Static row offsets of each section inside the packed weight buffer."""
    r0 = 0                   # wih_e^T : (D, 4H)
    r1 = r0 + _r8(D)         # whh_e^T : (H, 4H)
    r2 = r1 + _r8(H)         # b_e     : (1, 4H)
    r3 = r2 + 8              # wih_d^T : (H, 4D)
    r4 = r3 + _r8(H)         # whh_d^T : (D, 4D)
    r5 = r4 + _r8(D)         # b_d     : (1, 4D)
    total = r5 + 8
    return (r0, r1, r2, r3, r4, r5), total


# ----------------------------- Pallas kernel --------------------------------
def _lstm_ae_kernel(x_ref, w_ref, out_ref, *, T, B, D, H):
    """Fused LSTM-AE forward. Both inputs fully resident in VMEM.

    x_ref   : (B, T, D)            batch-first input, as given by the module
    w_ref   : (rows, max(4H,4D))   packed weights, PyTorch gate order [i,f,g,o]
                                   with a 2x scale folded into the g rows
    out_ref : (B, T*D)             decoder hidden states, lane-dense slab
    """
    f32 = jnp.float32
    (r0, r1, r2, r3, r4, r5), _ = _pack_offsets(D, H)
    W4H, W4D = 4 * H, 4 * D

    # one-time, statically-sliced weight views (lane offset 0 -> no realign)
    wih_e = w_ref[r0:r0 + D, 0:W4H]        # (D, 4H)
    whh_e = w_ref[r1:r1 + H, 0:W4H]        # (H, 4H)
    be    = w_ref[r2:r2 + 1, 0:W4H]        # (1, 4H)
    wih_d = w_ref[r3:r3 + H, 0:W4D]        # (H, 4D)
    whh_d = w_ref[r4:r4 + D, 0:W4D]        # (D, 4D)
    bd    = w_ref[r5:r5 + 1, 0:W4D]        # (1, 4D)

    # ---------------- encoder ----------------
    # Build the time-major (T*B, D) view in-kernel (off the serial chain) and
    # hoist the input projection into one time-parallel matmul.
    x_steps = [x_ref[:, t, :] for t in range(T)]              # T x (B, D)
    x_tbd = jnp.concatenate(x_steps, axis=0)                  # (T*B, D)
    xw_e = jnp.dot(x_tbd, wih_e, preferred_element_type=f32) + be   # (T*B, 4H)

    h = jnp.zeros((B, H), f32)
    c = jnp.zeros((B, H), f32)
    for t in range(T):                       # static unroll; fine at T=8
        gates = xw_e[t * B:(t + 1) * B, :] + jnp.dot(
            h, whh_e, preferred_element_type=f32)             # (B, 4H)
        s = jax.nn.sigmoid(gates)            # single EUP push over the vreg
        gi = s[:, 0:H]
        gf = s[:, H:2 * H]
        gg = 2.0 * s[:, 2 * H:3 * H] - 1.0   # == tanh(pre-fold g)
        go = s[:, 3 * H:4 * H]
        c = gf * c + gi * gg
        h = go * jnp.tanh(c)                 # second (and last) EUP push
    last = h                                 # == z[:, -1, :]

    # ---------------- decoder ----------------
    # Decoder input is `last` repeated over time -> single input projection.
    xw_d = jnp.dot(last, wih_d, preferred_element_type=f32) + bd     # (B, 4D)

    hd = jnp.zeros((B, D), f32)
    cd = jnp.zeros((B, D), f32)
    outs = []
    for t in range(T):
        gates = xw_d + jnp.dot(hd, whh_d, preferred_element_type=f32)  # (B, 4D)
        s = jax.nn.sigmoid(gates)
        gi = s[:, 0:D]
        gf = s[:, D:2 * D]
        gg = 2.0 * s[:, 2 * D:3 * D] - 1.0
        go = s[:, 3 * D:4 * D]
        cd = gf * cd + gi * gg
        hd = go * jnp.tanh(cd)
        outs.append(hd)                                               # (B, D)

    # single lane-dense slab store; wrapper reshape (B,T*D)->(B,T,D) is free
    out_ref[...] = jnp.concatenate(outs, axis=-1).astype(out_ref.dtype)


# ------------------------------ wrapper --------------------------------------
def _prep_lstm_weights(w_ih, w_hh, b_ih, b_hh):
    """PyTorch (4H, In)/(4H, H) layout -> transposed, bias-summed, with a 2x
    scale folded into the g-gate rows so tanh(g) = 2*sigmoid(g_scaled) - 1."""
    H4 = w_ih.shape[0]
    H = H4 // 4
    scale = jnp.concatenate([jnp.ones((2 * H,), jnp.float32),
                             jnp.full((H,), 2.0, jnp.float32),   # g rows
                             jnp.ones((H,), jnp.float32)])
    w_ih_t = (jnp.asarray(w_ih, jnp.float32) * scale[:, None]).T    # (In, 4H)
    w_hh_t = (jnp.asarray(w_hh, jnp.float32) * scale[:, None]).T    # (H, 4H)
    b = (jnp.asarray(b_ih, jnp.float32) + jnp.asarray(b_hh, jnp.float32)) * scale
    return w_ih_t, w_hh_t, b                                        # b: (4H,)


def _pack_params(enc_params, dec_params, D, H):
    """Pack all six weight/bias arrays into one 2-D f32 buffer (2 DMAs total)."""
    wih_e, whh_e, be = _prep_lstm_weights(**enc_params)   # (D,4H),(H,4H),(4H,)
    wih_d, whh_d, bd = _prep_lstm_weights(**dec_params)   # (H,4D),(D,4D),(4D,)
    (r0, r1, r2, r3, r4, r5), total = _pack_offsets(D, H)
    W = max(4 * H, 4 * D)
    buf = jnp.zeros((total, W), jnp.float32)
    buf = buf.at[r0:r0 + D, :4 * H].set(wih_e)
    buf = buf.at[r1:r1 + H, :4 * H].set(whh_e)
    buf = buf.at[r2, :4 * H].set(be)
    buf = buf.at[r3:r3 + H, :4 * D].set(wih_d)
    buf = buf.at[r4:r4 + D, :4 * D].set(whh_d)
    buf = buf.at[r5, :4 * D].set(bd)
    return buf


def lstm_ae_forward(x_btd, enc_params, dec_params):
    """x_btd: (B, T, D) -> (B, T, D), matching LSTMAE.forward (batch_first)."""
    x = jnp.asarray(x_btd, jnp.float32)
    B, T, D = x.shape
    H = enc_params["w_hh"].shape[1]

    w_buf = _pack_params(enc_params, dec_params, D=D, H=H)

    vmem = pl.BlockSpec(memory_space=pltpu.MemorySpace.VMEM)
    out_2d = pl.pallas_call(
        functools.partial(_lstm_ae_kernel, T=T, B=B, D=D, H=H),
        out_shape=jax.ShapeDtypeStruct((B, T * D), jnp.float32),
        in_specs=[vmem, vmem],
        out_specs=vmem,
    )(x, w_buf)

    return out_2d.reshape(B, T, D)           # bitcast reshape, no data movement


# ------------------------------ param init -----------------------------------
def init_lstm_params(key, input_dim, hidden_size):
    """PyTorch nn.LSTM default init: U(-1/sqrt(H), 1/sqrt(H)), gate order i,f,g,o."""
    k = 1.0 / (hidden_size ** 0.5)
    k1, k2, k3, k4 = jax.random.split(key, 4)
    u = lambda kk, shape: jax.random.uniform(kk, shape, jnp.float32, -k, k)
    return dict(
        w_ih=u(k1, (4 * hidden_size, input_dim)),
        w_hh=u(k2, (4 * hidden_size, hidden_size)),
        b_ih=u(k3, (4 * hidden_size,)),
        b_hh=u(k4, (4 * hidden_size,)),
    )


# ------------------------------ pure-JAX reference ---------------------------
def _lstm_ref(x_btd, w_ih, w_hh, b_ih, b_hh):
    B, T, _ = x_btd.shape
    H = w_hh.shape[1]

    def step(carry, x_t):
        h, c = carry
        gates = x_t @ w_ih.T + h @ w_hh.T + b_ih + b_hh
        i, f, g, o = jnp.split(gates, 4, axis=-1)
        i, f, o = jax.nn.sigmoid(i), jax.nn.sigmoid(f), jax.nn.sigmoid(o)
        g = jnp.tanh(g)
        c = f * c + i * g
        h = o * jnp.tanh(c)
        return (h, c), h

    h0 = jnp.zeros((B, H), jnp.float32)
    c0 = jnp.zeros((B, H), jnp.float32)
    _, hs = lax.scan(step, (h0, c0), jnp.transpose(x_btd, (1, 0, 2)))
    return jnp.transpose(hs, (1, 0, 2))


def _lstm_ae_ref(x_btd, enc_params, dec_params):
    z = _lstm_ref(x_btd, **enc_params)
    last = z[:, -1:, :]
    last_rep = jnp.tile(last, (1, x_btd.shape[1], 1))
    return _lstm_ref(last_rep, **dec_params)


# ----------------------------------- main -------------------------------------
if __name__ == "__main__":
    B, T, D, H = 2, 8, 8, 16   # batch, seq, input_dim, hidden_size

    key = jax.random.PRNGKey(0)
    k_x, k_enc, k_dec = jax.random.split(key, 3)

    x = jax.random.normal(k_x, (B, T, D), jnp.float32)
    enc_params = init_lstm_params(k_enc, input_dim=D, hidden_size=H)
    dec_params = init_lstm_params(k_dec, input_dim=H, hidden_size=D)

    out = jax.block_until_ready(jax.jit(lstm_ae_forward)(x, enc_params, dec_params))
    ref = jax.block_until_ready(_lstm_ae_ref(x, enc_params, dec_params))

    assert out.shape == (B, T, D)
    # slightly loosened vs 1e-5: tanh is computed as 2*sigmoid(2x)-1 in-kernel
    assert jnp.allclose(out, ref, atol=2e-5, rtol=2e-5), "Pallas LSTM AE mismatch"

    print("KERNEL_OK")
</pallas_src>

<mosaic_0001>
module attributes {stable_mosaic.version = 11 : i64} {
  func.func @_lstm_ae_kernel(%arg0: memref<2x8x8xf32, #tpu.memory_space<vmem>>, %arg1: memref<64x64xf32, #tpu.memory_space<vmem>>, %arg2: memref<2x64xf32, #tpu.memory_space<vmem>>) attributes {dimension_semantics = [], scalar_prefetch = 0 : i64, scratch_operands = 0 : i64, tpu.core_type = #tpu.core_type<tc>} {
    %c0 = arith.constant 0 : index
    %c0_0 = arith.constant 0 : index
    %0 = vector.load %arg1[%c0, %c0_0] : memref<64x64xf32, #tpu.memory_space<vmem>>, vector<8x64xf32>
    %c8 = arith.constant 8 : index
    %c0_1 = arith.constant 0 : index
    %1 = vector.load %arg1[%c8, %c0_1] : memref<64x64xf32, #tpu.memory_space<vmem>>, vector<16x64xf32>
    %c24 = arith.constant 24 : index
    %c0_2 = arith.constant 0 : index
    %2 = vector.load %arg1[%c24, %c0_2] : memref<64x64xf32, #tpu.memory_space<vmem>>, vector<1x64xf32>
    %c32 = arith.constant 32 : index
    %c0_3 = arith.constant 0 : index
    %3 = vector.load %arg1[%c32, %c0_3] : memref<64x64xf32, #tpu.memory_space<vmem>>, vector<16x32xf32>
    %c48 = arith.constant 48 : index
    %c0_4 = arith.constant 0 : index
    %4 = vector.load %arg1[%c48, %c0_4] : memref<64x64xf32, #tpu.memory_space<vmem>>, vector<8x32xf32>
    %c56 = arith.constant 56 : index
    %c0_5 = arith.constant 0 : index
    %5 = vector.load %arg1[%c56, %c0_5] : memref<64x64xf32, #tpu.memory_space<vmem>>, vector<1x32xf32>
    %c0_6 = arith.constant 0 : index
    %c0_7 = arith.constant 0 : index
    %c0_8 = arith.constant 0 : index
    %6 = vector.load %arg0[%c0_6, %c0_7, %c0_8] : memref<2x8x8xf32, #tpu.memory_space<vmem>>, vector<2x1x8xf32>
    %7 = vector.shape_cast %6 : vector<2x1x8xf32> to vector<2x8xf32>
    %c0_9 = arith.constant 0 : index
    %c1 = arith.constant 1 : index
    %c0_10 = arith.constant 0 : index
    %8 = vector.load %arg0[%c0_9, %c1, %c0_10] : memref<2x8x8xf32, #tpu.memory_space<vmem>>, vector<2x1x8xf32>
    %9 = vector.shape_cast %8 : vector<2x1x8xf32> to vector<2x8xf32>
    %c0_11 = arith.constant 0 : index
    %c2 = arith.constant 2 : index
    %c0_12 = arith.constant 0 : index
    %10 = vector.load %arg0[%c0_11, %c2, %c0_12] : memref<2x8x8xf32, #tpu.memory_space<vmem>>, vector<2x1x8xf32>
    %11 = vector.shape_cast %10 : vector<2x1x8xf32> to vector<2x8xf32>
    %c0_13 = arith.constant 0 : index
    %c3 = arith.constant 3 : index
    %c0_14 = arith.constant 0 : index
    %12 = vector.load %arg0[%c0_13, %c3, %c0_14] : memref<2x8x8xf32, #tpu.memory_space<vmem>>, vector<2x1x8xf32>
    %13 = vector.shape_cast %12 : vector<2x1x8xf32> to vector<2x8xf32>
    %c0_15 = arith.constant 0 : index
    %c4 = arith.constant 4 : index
    %c0_16 = arith.constant 0 : index
    %14 = vector.load %arg0[%c0_15, %c4, %c0_16] : memref<2x8x8xf32, #tpu.memory_space<vmem>>, vector<2x1x8xf32>
    %15 = vector.shape_cast %14 : vector<2x1x8xf32> to vector<2x8xf32>
    %c0_17 = arith.constant 0 : index
    %c5 = arith.constant 5 : index
    %c0_18 = arith.constant 0 : index
    %16 = vector.load %arg0[%c0_17, %c5, %c0_18] : memref<2x8x8xf32, #tpu.memory_space<vmem>>, vector<2x1x8xf32>
    %17 = vector.shape_cast %16 : vector<2x1x8xf32> to vector<2x8xf32>
    %c0_19 = arith.constant 0 : index
    %c6 = arith.constant 6 : index
    %c0_20 = arith.constant 0 : index
    %18 = vector.load %arg0[%c0_19, %c6, %c0_20] : memref<2x8x8xf32, #tpu.memory_space<vmem>>, vector<2x1x8xf32>
    %19 = vector.shape_cast %18 : vector<2x1x8xf32> to vector<2x8xf32>
    %c0_21 = arith.constant 0 : index
    %c7 = arith.constant 7 : index
    %c0_22 = arith.constant 0 : index
    %20 = vector.load %arg0[%c0_21, %c7, %c0_22] : memref<2x8x8xf32, #tpu.memory_space<vmem>>, vector<2x1x8xf32>
    %21 = vector.shape_cast %20 : vector<2x1x8xf32> to vector<2x8xf32>
    %22 = tpu.concatenate %7, %9, %11, %13, %15, %17, %19, %21 in 0 : vector<2x8xf32>, vector<2x8xf32>, vector<2x8xf32>, vector<2x8xf32>, vector<2x8xf32>, vector<2x8xf32>, vector<2x8xf32>, vector<2x8xf32> -> vector<16x8xf32>
    %cst = arith.constant dense<0.000000e+00> : vector<16x64xf32>
    %23 = tpu.matmul %22, %0, %cst {dimension_numbers = #tpu.dot_dimension_numbers<[1], [0], [0], [1], [0, 0, 1, 1], [], []>} : vector<16x8xf32>, vector<8x64xf32>, vector<16x64xf32> -> vector<16x64xf32>
    %24 = vector.broadcast %2 : vector<1x64xf32> to vector<16x64xf32>
    %25 = arith.addf %23, %24 : vector<16x64xf32>
    %cst_23 = arith.constant 0.000000e+00 : f32
    %26 = vector.broadcast %cst_23 : f32 to vector<2x16xf32>
    %cst_24 = arith.constant 0.000000e+00 : f32
    %27 = vector.broadcast %cst_24 : f32 to vector<2x16xf32>
    %28 = vector.extract_strided_slice %25 {offsets = [0, 0], sizes = [2, 64], strides = [1, 1]} : vector<16x64xf32> to vector<2x64xf32>
    %cst_25 = arith.constant dense<0.000000e+00> : vector<2x64xf32>
    %29 = tpu.matmul %26, %1, %cst_25 {dimension_numbers = #tpu.dot_dimension_numbers<[1], [0], [0], [1], [0, 0, 1, 1], [], []>} : vector<2x16xf32>, vector<16x64xf32>, vector<2x64xf32> -> vector<2x64xf32>
    %30 = arith.addf %28, %29 : vector<2x64xf32>
    %31 = arith.negf %30 : vector<2x64xf32>
    %32 = math.exp %31 : vector<2x64xf32>
    %cst_26 = arith.constant 1.000000e+00 : f32
    %33 = vector.broadcast %cst_26 : f32 to vector<2x64xf32>
    %34 = arith.addf %33, %32 : vector<2x64xf32>
    %35 = arith.divf %33, %34 : vector<2x64xf32>
    %36 = vector.extract_strided_slice %35 {offsets = [0, 0], sizes = [2, 16], strides = [1, 1]} : vector<2x64xf32> to vector<2x16xf32>
    %37 = vector.extract_strided_slice %35 {offsets = [0, 16], sizes = [2, 16], strides = [1, 1]} : vector<2x64xf32> to vector<2x16xf32>
    %38 = vector.extract_strided_slice %35 {offsets = [0, 32], sizes = [2, 16], strides = [1, 1]} : vector<2x64xf32> to vector<2x16xf32>
    %cst_27 = arith.constant 2.000000e+00 : f32
    %39 = vector.broadcast %cst_27 : f32 to vector<2x16xf32>
    %40 = arith.mulf %39, %38 : vector<2x16xf32>
    %cst_28 = arith.constant 1.000000e+00 : f32
    %41 = vector.broadcast %cst_28 : f32 to vector<2x16xf32>
    %42 = arith.subf %40, %41 : vector<2x16xf32>
    %43 = vector.extract_strided_slice %35 {offsets = [0, 48], sizes = [2, 16], strides = [1, 1]} : vector<2x64xf32> to vector<2x16xf32>
    %44 = arith.mulf %37, %27 : vector<2x16xf32>
    %45 = arith.mulf %36, %42 : vector<2x16xf32>
    %46 = arith.addf %44, %45 : vector<2x16xf32>
    %47 = math.tanh %46 : vector<2x16xf32>
    %48 = arith.mulf %43, %47 : vector<2x16xf32>
    %49 = vector.extract_strided_slice %25 {offsets = [2, 0], sizes = [2, 64], strides = [1, 1]} : vector<16x64xf32> to vector<2x64xf32>
    %cst_29 = arith.constant dense<0.000000e+00> : vector<2x64xf32>
    %50 = tpu.matmul %48, %1, %cst_29 {dimension_numbers = #tpu.dot_dimension_numbers<[1], [0], [0], [1], [0, 0, 1, 1], [], []>} : vector<2x16xf32>, vector<16x64xf32>, vector<2x64xf32> -> vector<2x64xf32>
    %51 = arith.addf %49, %50 : vector<2x64xf32>
    %52 = arith.negf %51 : vector<2x64xf32>
    %53 = math.exp %52 : vector<2x64xf32>
    %cst_30 = arith.constant 1.000000e+00 : f32
    %54 = vector.broadcast %cst_30 : f32 to vector<2x64xf32>
    %55 = arith.addf %54, %53 : vector<2x64xf32>
    %56 = arith.divf %54, %55 : vector<2x64xf32>
    %57 = vector.extract_strided_slice %56 {offsets = [0, 0], sizes = [2, 16], strides = [1, 1]} : vector<2x64xf32> to vector<2x16xf32>
    %58 = vector.extract_strided_slice %56 {offsets = [0, 16], sizes = [2, 16], strides = [1, 1]} : vector<2x64xf32> to vector<2x16xf32>
    %59 = vector.extract_strided_slice %56 {offsets = [0, 32], sizes = [2, 16], strides = [1, 1]} : vector<2x64xf32> to vector<2x16xf32>
    %cst_31 = arith.constant 2.000000e+00 : f32
    %60 = vector.broadcast %cst_31 : f32 to vector<2x16xf32>
    %61 = arith.mulf %60, %59 : vector<2x16xf32>
    %cst_32 = arith.constant 1.000000e+00 : f32
    %62 = vector.broadcast %cst_32 : f32 to vector<2x16xf32>
    %63 = arith.subf %61, %62 : vector<2x16xf32>
    %64 = vector.extract_strided_slice %56 {offsets = [0, 48], sizes = [2, 16], strides = [1, 1]} : vector<2x64xf32> to vector<2x16xf32>
    %65 = arith.mulf %58, %46 : vector<2x16xf32>
    %66 = arith.mulf %57, %63 : vector<2x16xf32>
    %67 = arith.addf %65, %66 : vector<2x16xf32>
    %68 = math.tanh %67 : vector<2x16xf32>
    %69 = arith.mulf %64, %68 : vector<2x16xf32>
    %70 = vector.extract_strided_slice %25 {offsets = [4, 0], sizes = [2, 64], strides = [1, 1]} : vector<16x64xf32> to vector<2x64xf32>
    %cst_33 = arith.constant dense<0.000000e+00> : vector<2x64xf32>
    %71 = tpu.matmul %69, %1, %cst_33 {dimension_numbers = #tpu.dot_dimension_numbers<[1], [0], [0], [1], [0, 0, 1, 1], [], []>} : vector<2x16xf32>, vector<16x64xf32>, vector<2x64xf32> -> vector<2x64xf32>
    %72 = arith.addf %70, %71 : vector<2x64xf32>
    %73 = arith.negf %72 : vector<2x64xf32>
    %74 = math.exp %73 : vector<2x64xf32>
    %cst_34 = arith.constant 1.000000e+00 : f32
    %75 = vector.broadcast %cst_34 : f32 to vector<2x64xf32>
    %76 = arith.addf %75, %74 : vector<2x64xf32>
    %77 = arith.divf %75, %76 : vector<2x64xf32>
    %78 = vector.extract_strided_slice %77 {offsets = [0, 0], sizes = [2, 16], strides = [1, 1]} : vector<2x64xf32> to vector<2x16xf32>
    %79 = vector.extract_strided_slice %77 {offsets = [0, 16], sizes = [2, 16], strides = [1, 1]} : vector<2x64xf32> to vector<2x16xf32>
    %80 = vector.extract_strided_slice %77 {offsets = [0, 32], sizes = [2, 16], strides = [1, 1]} : vector<2x64xf32> to vector<2x16xf32>
    %cst_35 = arith.constant 2.000000e+00 : f32
    %81 = vector.broadcast %cst_35 : f32 to vector<2x16xf32>
    %82 = arith.mulf %81, %80 : vector<2x16xf32>
    %cst_36 = arith.constant 1.000000e+00 : f32
    %83 = vector.broadcast %cst_36 : f32 to vector<2x16xf32>
    %84 = arith.subf %82, %83 : vector<2x16xf32>
    %85 = vector.extract_strided_slice %77 {offsets = [0, 48], sizes = [2, 16], strides = [1, 1]} : vector<2x64xf32> to vector<2x16xf32>
    %86 = arith.mulf %79, %67 : vector<2x16xf32>
    %87 = arith.mulf %78, %84 : vector<2x16xf32>
    %88 = arith.addf %86, %87 : vector<2x16xf32>
    %89 = math.tanh %88 : vector<2x16xf32>
    %90 = arith.mulf %85, %89 : vector<2x16xf32>
    %91 = vector.extract_strided_slice %25 {offsets = [6, 0], sizes = [2, 64], strides = [1, 1]} : vector<16x64xf32> to vector<2x64xf32>
    %cst_37 = arith.constant dense<0.000000e+00> : vector<2x64xf32>
    %92 = tpu.matmul %90, %1, %cst_37 {dimension_numbers = #tpu.dot_dimension_numbers<[1], [0], [0], [1], [0, 0, 1, 1], [], []>} : vector<2x16xf32>, vector<16x64xf32>, vector<2x64xf32> -> vector<2x64xf32>
    %93 = arith.addf %91, %92 : vector<2x64xf32>
    %94 = arith.negf %93 : vector<2x64xf32>
    %95 = math.exp %94 : vector<2x64xf32>
    %cst_38 = arith.constant 1.000000e+00 : f32
    %96 = vector.broadcast %cst_38 : f32 to vector<2x64xf32>
    %97 = arith.addf %96, %95 : vector<2x64xf32>
    %98 = arith.divf %96, %97 : vector<2x64xf32>
    %99 = vector.extract_strided_slice %98 {offsets = [0, 0], sizes = [2, 16], strides = [1, 1]} : vector<2x64xf32> to vector<2x16xf32>
    %100 = vector.extract_strided_slice %98 {offsets = [0, 16], sizes = [2, 16], strides = [1, 1]} : vector<2x64xf32> to vector<2x16xf32>
    %101 = vector.extract_strided_slice %98 {offsets = [0, 32], sizes = [2, 16], strides = [1, 1]} : vector<2x64xf32> to vector<2x16xf32>
    %cst_39 = arith.constant 2.000000e+00 : f32
    %102 = vector.broadcast %cst_39 : f32 to vector<2x16xf32>
    %103 = arith.mulf %102, %101 : vector<2x16xf32>
    %cst_40 = arith.constant 1.000000e+00 : f32
    %104 = vector.broadcast %cst_40 : f32 to vector<2x16xf32>
    %105 = arith.subf %103, %104 : vector<2x16xf32>
    %106 = vector.extract_strided_slice %98 {offsets = [0, 48], sizes = [2, 16], strides = [1, 1]} : vector<2x64xf32> to vector<2x16xf32>
    %107 = arith.mulf %100, %88 : vector<2x16xf32>
    %108 = arith.mulf %99, %105 : vector<2x16xf32>
    %109 = arith.addf %107, %108 : vector<2x16xf32>
    %110 = math.tanh %109 : vector<2x16xf32>
    %111 = arith.mulf %106, %110 : vector<2x16xf32>
    %112 = vector.extract_strided_slice %25 {offsets = [8, 0], sizes = [2, 64], strides = [1, 1]} : vector<16x64xf32> to vector<2x64xf32>
    %cst_41 = arith.constant dense<0.000000e+00> : vector<2x64xf32>
    %113 = tpu.matmul %111, %1, %cst_41 {dimension_numbers = #tpu.dot_dimension_numbers<[1], [0], [0], [1], [0, 0, 1, 1], [], []>} : vector<2x16xf32>, vector<16x64xf32>, vector<2x64xf32> -> vector<2x64xf32>
    %114 = arith.addf %112, %113 : vector<2x64xf32>
    %115 = arith.negf %114 : vector<2x64xf32>
    %116 = math.exp %115 : vector<2x64xf32>
    %cst_42 = arith.constant 1.000000e+00 : f32
    %117 = vector.broadcast %cst_42 : f32 to vector<2x64xf32>
    %118 = arith.addf %117, %116 : vector<2x64xf32>
    %119 = arith.divf %117, %118 : vector<2x64xf32>
    %120 = vector.extract_strided_slice %119 {offsets = [0, 0], sizes = [2, 16], strides = [1, 1]} : vector<2x64xf32> to vector<2x16xf32>
    %121 = vector.extract_strided_slice %119 {offsets = [0, 16], sizes = [2, 16], strides = [1, 1]} : vector<2x64xf32> to vector<2x16xf32>
    %122 = vector.extract_strided_slice %119 {offsets = [0, 32], sizes = [2, 16], strides = [1, 1]} : vector<2x64xf32> to vector<2x16xf32>
    %cst_43 = arith.constant 2.000000e+00 : f32
    %123 = vector.broadcast %cst_43 : f32 to vector<2x16xf32>
    %124 = arith.mulf %123, %122 : vector<2x16xf32>
    %cst_44 = arith.constant 1.000000e+00 : f32
    %125 = vector.broadcast %cst_44 : f32 to vector<2x16xf32>
    %126 = arith.subf %124, %125 : vector<2x16xf32>
    %127 = vector.extract_strided_slice %119 {offsets = [0, 48], sizes = [2, 16], strides = [1, 1]} : vector<2x64xf32> to vector<2x16xf32>
    %128 = arith.mulf %121, %109 : vector<2x16xf32>
    %129 = arith.mulf %120, %126 : vector<2x16xf32>
    %130 = arith.addf %128, %129 : vector<2x16xf32>
    %131 = math.tanh %130 : vector<2x16xf32>
    %132 = arith.mulf %127, %131 : vector<2x16xf32>
    %133 = vector.extract_strided_slice %25 {offsets = [10, 0], sizes = [2, 64], strides = [1, 1]} : vector<16x64xf32> to vector<2x64xf32>
    %cst_45 = arith.constant dense<0.000000e+00> : vector<2x64xf32>
    %134 = tpu.matmul %132, %1, %cst_45 {dimension_numbers = #tpu.dot_dimension_numbers<[1], [0], [0], [1], [0, 0, 1, 1], [], []>} : vector<2x16xf32>, vector<16x64xf32>, vector<2x64xf32> -> vector<2x64xf32>
    %135 = arith.addf %133, %134 : vector<2x64xf32>
    %136 = arith.negf %135 : vector<2x64xf32>
    %137 = math.exp %136 : vector<2x64xf32>
    %cst_46 = arith.constant 1.000000e+00 : f32
    %138 = vector.broadcast %cst_46 : f32 to vector<2x64xf32>
    %139 = arith.addf %138, %137 : vector<2x64xf32>
    %140 = arith.divf %138, %139 : vector<2x64xf32>
    %141 = vector.extract_strided_slice %140 {offsets = [0, 0], sizes = [2, 16], strides = [1, 1]} : vector<2x64xf32> to vector<2x16xf32>
    %142 = vector.extract_strided_slice %140 {offsets = [0, 16], sizes = [2, 16], strides = [1, 1]} : vector<2x64xf32> to vector<2x16xf32>
    %143 = vector.extract_strided_slice %140 {offsets = [0, 32], sizes = [2, 16], strides = [1, 1]} : vector<2x64xf32> to vector<2x16xf32>
    %cst_47 = arith.constant 2.000000e+00 : f32
    %144 = vector.broadcast %cst_47 : f32 to vector<2x16xf32>
    %145 = arith.mulf %144, %143 : vector<2x16xf32>
    %cst_48 = arith.constant 1.000000e+00 : f32
    %146 = vector.broadcast %cst_48 : f32 to vector<2x16xf32>
    %147 = arith.subf %145, %146 : vector<2x16xf32>
    %148 = vector.extract_strided_slice %140 {offsets = [0, 48], sizes = [2, 16], strides = [1, 1]} : vector<2x64xf32> to vector<2x16xf32>
    %149 = arith.mulf %142, %130 : vector<2x16xf32>
    %150 = arith.mulf %141, %147 : vector<2x16xf32>
    %151 = arith.addf %149, %150 : vector<2x16xf32>
    %152 = math.tanh %151 : vector<2x16xf32>
    %153 = arith.mulf %148, %152 : vector<2x16xf32>
    %154 = vector.extract_strided_slice %25 {offsets = [12, 0], sizes = [2, 64], strides = [1, 1]} : vector<16x64xf32> to vector<2x64xf32>
    %cst_49 = arith.constant dense<0.000000e+00> : vector<2x64xf32>
    %155 = tpu.matmul %153, %1, %cst_49 {dimension_numbers = #tpu.dot_dimension_numbers<[1], [0], [0], [1], [0, 0, 1, 1], [], []>} : vector<2x16xf32>, vector<16x64xf32>, vector<2x64xf32> -> vector<2x64xf32>
    %156 = arith.addf %154, %155 : vector<2x64xf32>
    %157 = arith.negf %156 : vector<2x64xf32>
    %158 = math.exp %157 : vector<2x64xf32>
    %cst_50 = arith.constant 1.000000e+00 : f32
    %159 = vector.broadcast %cst_50 : f32 to vector<2x64xf32>
    %160 = arith.addf %159, %158 : vector<2x64xf32>
    %161 = arith.divf %159, %160 : vector<2x64xf32>
    %162 = vector.extract_strided_slice %161 {offsets = [0, 0], sizes = [2, 16], strides = [1, 1]} : vector<2x64xf32> to vector<2x16xf32>
    %163 = vector.extract_strided_slice %161 {offsets = [0, 16], sizes = [2, 16], strides = [1, 1]} : vector<2x64xf32> to vector<2x16xf32>
    %164 = vector.extract_strided_slice %161 {offsets = [0, 32], sizes = [2, 16], strides = [1, 1]} : vector<2x64xf32> to vector<2x16xf32>
    %cst_51 = arith.constant 2.000000e+00 : f32
    %165 = vector.broadcast %cst_51 : f32 to vector<2x16xf32>
    %166 = arith.mulf %165, %164 : vector<2x16xf32>
    %cst_52 = arith.constant 1.000000e+00 : f32
    %167 = vector.broadcast %cst_52 : f32 to vector<2x16xf32>
    %168 = arith.subf %166, %167 : vector<2x16xf32>
    %169 = vector.extract_strided_slice %161 {offsets = [0, 48], sizes = [2, 16], strides = [1, 1]} : vector<2x64xf32> to vector<2x16xf32>
    %170 = arith.mulf %163, %151 : vector<2x16xf32>
    %171 = arith.mulf %162, %168 : vector<2x16xf32>
    %172 = arith.addf %170, %171 : vector<2x16xf32>
    %173 = math.tanh %172 : vector<2x16xf32>
    %174 = arith.mulf %169, %173 : vector<2x16xf32>
    %175 = vector.extract_strided_slice %25 {offsets = [14, 0], sizes = [2, 64], strides = [1, 1]} : vector<16x64xf32> to vector<2x64xf32>
    %cst_53 = arith.constant dense<0.000000e+00> : vector<2x64xf32>
    %176 = tpu.matmul %174, %1, %cst_53 {dimension_numbers = #tpu.dot_dimension_numbers<[1], [0], [0], [1], [0, 0, 1, 1], [], []>} : vector<2x16xf32>, vector<16x64xf32>, vector<2x64xf32> -> vector<2x64xf32>
    %177 = arith.addf %175, %176 : vector<2x64xf32>
    %178 = arith.negf %177 : vector<2x64xf32>
    %179 = math.exp %178 : vector<2x64xf32>
    %cst_54 = arith.constant 1.000000e+00 : f32
    %180 = vector.broadcast %cst_54 : f32 to vector<2x64xf32>
    %181 = arith.addf %180, %179 : vector<2x64xf32>
    %182 = arith.divf %180, %181 : vector<2x64xf32>
    %183 = vector.extract_strided_slice %182 {offsets = [0, 0], sizes = [2, 16], strides = [1, 1]} : vector<2x64xf32> to vector<2x16xf32>
    %184 = vector.extract_strided_slice %182 {offsets = [0, 16], sizes = [2, 16], strides = [1, 1]} : vector<2x64xf32> to vector<2x16xf32>
    %185 = vector.extract_strided_slice %182 {offsets = [0, 32], sizes = [2, 16], strides = [1, 1]} : vector<2x64xf32> to vector<2x16xf32>
    %cst_55 = arith.constant 2.000000e+00 : f32
    %186 = vector.broadcast %cst_55 : f32 to vector<2x16xf32>
    %187 = arith.mulf %186, %185 : vector<2x16xf32>
    %cst_56 = arith.constant 1.000000e+00 : f32
    %188 = vector.broadcast %cst_56 : f32 to vector<2x16xf32>
    %189 = arith.subf %187, %188 : vector<2x16xf32>
    %190 = vector.extract_strided_slice %182 {offsets = [0, 48], sizes = [2, 16], strides = [1, 1]} : vector<2x64xf32> to vector<2x16xf32>
    %191 = arith.mulf %184, %172 : vector<2x16xf32>
    %192 = arith.mulf %183, %189 : vector<2x16xf32>
    %193 = arith.addf %191, %192 : vector<2x16xf32>
    %194 = math.tanh %193 : vector<2x16xf32>
    %195 = arith.mulf %190, %194 : vector<2x16xf32>
    %cst_57 = arith.constant dense<0.000000e+00> : vector<2x32xf32>
    %196 = tpu.matmul %195, %3, %cst_57 {dimension_numbers = #tpu.dot_dimension_numbers<[1], [0], [0], [1], [0, 0, 1, 1], [], []>} : vector<2x16xf32>, vector<16x32xf32>, vector<2x32xf32> -> vector<2x32xf32>
    %197 = vector.broadcast %5 : vector<1x32xf32> to vector<2x32xf32>
    %198 = arith.addf %196, %197 : vector<2x32xf32>
    %cst_58 = arith.constant 0.000000e+00 : f32
    %199 = vector.broadcast %cst_58 : f32 to vector<2x8xf32>
    %cst_59 = arith.constant 0.000000e+00 : f32
    %200 = vector.broadcast %cst_59 : f32 to vector<2x8xf32>
    %cst_60 = arith.constant dense<0.000000e+00> : vector<2x32xf32>
    %201 = tpu.matmul %199, %4, %cst_60 {dimension_numbers = #tpu.dot_dimension_numbers<[1], [0], [0], [1], [0, 0, 1, 1], [], []>} : vector<2x8xf32>, vector<8x32xf32>, vector<2x32xf32> -> vector<2x32xf32>
    %202 = arith.addf %198, %201 : vector<2x32xf32>
    %203 = arith.negf %202 : vector<2x32xf32>
    %204 = math.exp %203 : vector<2x32xf32>
    %cst_61 = arith.constant 1.000000e+00 : f32
    %205 = vector.broadcast %cst_61 : f32 to vector<2x32xf32>
    %206 = arith.addf %205, %204 : vector<2x32xf32>
    %207 = arith.divf %205, %206 : vector<2x32xf32>
    %208 = vector.extract_strided_slice %207 {offsets = [0, 0], sizes = [2, 8], strides = [1, 1]} : vector<2x32xf32> to vector<2x8xf32>
    %209 = vector.extract_strided_slice %207 {offsets = [0, 8], sizes = [2, 8], strides = [1, 1]} : vector<2x32xf32> to vector<2x8xf32>
    %210 = vector.extract_strided_slice %207 {offsets = [0, 16], sizes = [2, 8], strides = [1, 1]} : vector<2x32xf32> to vector<2x8xf32>
    %cst_62 = arith.constant 2.000000e+00 : f32
    %211 = vector.broadcast %cst_62 : f32 to vector<2x8xf32>
    %212 = arith.mulf %211, %210 : vector<2x8xf32>
    %cst_63 = arith.constant 1.000000e+00 : f32
    %213 = vector.broadcast %cst_63 : f32 to vector<2x8xf32>
    %214 = arith.subf %212, %213 : vector<2x8xf32>
    %215 = vector.extract_strided_slice %207 {offsets = [0, 24], sizes = [2, 8], strides = [1, 1]} : vector<2x32xf32> to vector<2x8xf32>
    %216 = arith.mulf %209, %200 : vector<2x8xf32>
    %217 = arith.mulf %208, %214 : vector<2x8xf32>
    %218 = arith.addf %216, %217 : vector<2x8xf32>
    %219 = math.tanh %218 : vector<2x8xf32>
    %220 = arith.mulf %215, %219 : vector<2x8xf32>
    %cst_64 = arith.constant dense<0.000000e+00> : vector<2x32xf32>
    %221 = tpu.matmul %220, %4, %cst_64 {dimension_numbers = #tpu.dot_dimension_numbers<[1], [0], [0], [1], [0, 0, 1, 1], [], []>} : vector<2x8xf32>, vector<8x32xf32>, vector<2x32xf32> -> vector<2x32xf32>
    %222 = arith.addf %198, %221 : vector<2x32xf32>
    %223 = arith.negf %222 : vector<2x32xf32>
    %224 = math.exp %223 : vector<2x32xf32>
    %cst_65 = arith.constant 1.000000e+00 : f32
    %225 = vector.broadcast %cst_65 : f32 to vector<2x32xf32>
    %226 = arith.addf %225, %224 : vector<2x32xf32>
    %227 = arith.divf %225, %226 : vector<2x32xf32>
    %228 = vector.extract_strided_slice %227 {offsets = [0, 0], sizes = [2, 8], strides = [1, 1]} : vector<2x32xf32> to vector<2x8xf32>
    %229 = vector.extract_strided_slice %227 {offsets = [0, 8], sizes = [2, 8], strides = [1, 1]} : vector<2x32xf32> to vector<2x8xf32>
    %230 = vector.extract_strided_slice %227 {offsets = [0, 16], sizes = [2, 8], strides = [1, 1]} : vector<2x32xf32> to vector<2x8xf32>
    %cst_66 = arith.constant 2.000000e+00 : f32
    %231 = vector.broadcast %cst_66 : f32 to vector<2x8xf32>
    %232 = arith.mulf %231, %230 : vector<2x8xf32>
    %cst_67 = arith.constant 1.000000e+00 : f32
    %233 = vector.broadcast %cst_67 : f32 to vector<2x8xf32>
    %234 = arith.subf %232, %233 : vector<2x8xf32>
    %235 = vector.extract_strided_slice %227 {offsets = [0, 24], sizes = [2, 8], strides = [1, 1]} : vector<2x32xf32> to vector<2x8xf32>
    %236 = arith.mulf %229, %218 : vector<2x8xf32>
    %237 = arith.mulf %228, %234 : vector<2x8xf32>
    %238 = arith.addf %236, %237 : vector<2x8xf32>
    %239 = math.tanh %238 : vector<2x8xf32>
    %240 = arith.mulf %235, %239 : vector<2x8xf32>
    %cst_68 = arith.constant dense<0.000000e+00> : vector<2x32xf32>
    %241 = tpu.matmul %240, %4, %cst_68 {dimension_numbers = #tpu.dot_dimension_numbers<[1], [0], [0], [1], [0, 0, 1, 1], [], []>} : vector<2x8xf32>, vector<8x32xf32>, vector<2x32xf32> -> vector<2x32xf32>
    %242 = arith.addf %198, %241 : vector<2x32xf32>
    %243 = arith.negf %242 : vector<2x32xf32>
    %244 = math.exp %243 : vector<2x32xf32>
    %cst_69 = arith.constant 1.000000e+00 : f32
    %245 = vector.broadcast %cst_69 : f32 to vector<2x32xf32>
    %246 = arith.addf %245, %244 : vector<2x32xf32>
    %247 = arith.divf %245, %246 : vector<2x32xf32>
    %248 = vector.extract_strided_slice %247 {offsets = [0, 0], sizes = [2, 8], strides = [1, 1]} : vector<2x32xf32> to vector<2x8xf32>
    %249 = vector.extract_strided_slice %247 {offsets = [0, 8], sizes = [2, 8], strides = [1, 1]} : vector<2x32xf32> to vector<2x8xf32>
    %250 = vector.extract_strided_slice %247 {offsets = [0, 16], sizes = [2, 8], strides = [1, 1]} : vector<2x32xf32> to vector<2x8xf32>
    %cst_70 = arith.constant 2.000000e+00 : f32
    %251 = vector.broadcast %cst_70 : f32 to vector<2x8xf32>
    %252 = arith.mulf %251, %250 : vector<2x8xf32>
    %cst_71 = arith.constant 1.000000e+00 : f32
    %253 = vector.broadcast %cst_71 : f32 to vector<2x8xf32>
    %254 = arith.subf %252, %253 : vector<2x8xf32>
    %255 = vector.extract_strided_slice %247 {offsets = [0, 24], sizes = [2, 8], strides = [1, 1]} : vector<2x32xf32> to vector<2x8xf32>
    %256 = arith.mulf %249, %238 : vector<2x8xf32>
    %257 = arith.mulf %248, %254 : vector<2x8xf32>
    %258 = arith.addf %256, %257 : vector<2x8xf32>
    %259 = math.tanh %258 : vector<2x8xf32>
    %260 = arith.mulf %255, %259 : vector<2x8xf32>
    %cst_72 = arith.constant dense<0.000000e+00> : vector<2x32xf32>
    %261 = tpu.matmul %260, %4, %cst_72 {dimension_numbers = #tpu.dot_dimension_numbers<[1], [0], [0], [1], [0, 0, 1, 1], [], []>} : vector<2x8xf32>, vector<8x32xf32>, vector<2x32xf32> -> vector<2x32xf32>
    %262 = arith.addf %198, %261 : vector<2x32xf32>
    %263 = arith.negf %262 : vector<2x32xf32>
    %264 = math.exp %263 : vector<2x32xf32>
    %cst_73 = arith.constant 1.000000e+00 : f32
    %265 = vector.broadcast %cst_73 : f32 to vector<2x32xf32>
    %266 = arith.addf %265, %264 : vector<2x32xf32>
    %267 = arith.divf %265, %266 : vector<2x32xf32>
    %268 = vector.extract_strided_slice %267 {offsets = [0, 0], sizes = [2, 8], strides = [1, 1]} : vector<2x32xf32> to vector<2x8xf32>
    %269 = vector.extract_strided_slice %267 {offsets = [0, 8], sizes = [2, 8], strides = [1, 1]} : vector<2x32xf32> to vector<2x8xf32>
    %270 = vector.extract_strided_slice %267 {offsets = [0, 16], sizes = [2, 8], strides = [1, 1]} : vector<2x32xf32> to vector<2x8xf32>
    %cst_74 = arith.constant 2.000000e+00 : f32
    %271 = vector.broadcast %cst_74 : f32 to vector<2x8xf32>
    %272 = arith.mulf %271, %270 : vector<2x8xf32>
    %cst_75 = arith.constant 1.000000e+00 : f32
    %273 = vector.broadcast %cst_75 : f32 to vector<2x8xf32>
    %274 = arith.subf %272, %273 : vector<2x8xf32>
    %275 = vector.extract_strided_slice %267 {offsets = [0, 24], sizes = [2, 8], strides = [1, 1]} : vector<2x32xf32> to vector<2x8xf32>
    %276 = arith.mulf %269, %258 : vector<2x8xf32>
    %277 = arith.mulf %268, %274 : vector<2x8xf32>
    %278 = arith.addf %276, %277 : vector<2x8xf32>
    %279 = math.tanh %278 : vector<2x8xf32>
    %280 = arith.mulf %275, %279 : vector<2x8xf32>
    %cst_76 = arith.constant dense<0.000000e+00> : vector<2x32xf32>
    %281 = tpu.matmul %280, %4, %cst_76 {dimension_numbers = #tpu.dot_dimension_numbers<[1], [0], [0], [1], [0, 0, 1, 1], [], []>} : vector<2x8xf32>, vector<8x32xf32>, vector<2x32xf32> -> vector<2x32xf32>
    %282 = arith.addf %198, %281 : vector<2x32xf32>
    %283 = arith.negf %282 : vector<2x32xf32>
    %284 = math.exp %283 : vector<2x32xf32>
    %cst_77 = arith.constant 1.000000e+00 : f32
    %285 = vector.broadcast %cst_77 : f32 to vector<2x32xf32>
    %286 = arith.addf %285, %284 : vector<2x32xf32>
    %287 = arith.divf %285, %286 : vector<2x32xf32>
    %288 = vector.extract_strided_slice %287 {offsets = [0, 0], sizes = [2, 8], strides = [1, 1]} : vector<2x32xf32> to vector<2x8xf32>
    %289 = vector.extract_strided_slice %287 {offsets = [0, 8], sizes = [2, 8], strides = [1, 1]} : vector<2x32xf32> to vector<2x8xf32>
    %290 = vector.extract_strided_slice %287 {offsets = [0, 16], sizes = [2, 8], strides = [1, 1]} : vector<2x32xf32> to vector<2x8xf32>
    %cst_78 = arith.constant 2.000000e+00 : f32
    %291 = vector.broadcast %cst_78 : f32 to vector<2x8xf32>
    %292 = arith.mulf %291, %290 : vector<2x8xf32>
    %cst_79 = arith.constant 1.000000e+00 : f32
    %293 = vector.broadcast %cst_79 : f32 to vector<2x8xf32>
    %294 = arith.subf %292, %293 : vector<2x8xf32>
    %295 = vector.extract_strided_slice %287 {offsets = [0, 24], sizes = [2, 8], strides = [1, 1]} : vector<2x32xf32> to vector<2x8xf32>
    %296 = arith.mulf %289, %278 : vector<2x8xf32>
    %297 = arith.mulf %288, %294 : vector<2x8xf32>
    %298 = arith.addf %296, %297 : vector<2x8xf32>
    %299 = math.tanh %298 : vector<2x8xf32>
    %300 = arith.mulf %295, %299 : vector<2x8xf32>
    %cst_80 = arith.constant dense<0.000000e+00> : vector<2x32xf32>
    %301 = tpu.matmul %300, %4, %cst_80 {dimension_numbers = #tpu.dot_dimension_numbers<[1], [0], [0], [1], [0, 0, 1, 1], [], []>} : vector<2x8xf32>, vector<8x32xf32>, vector<2x32xf32> -> vector<2x32xf32>
    %302 = arith.addf %198, %301 : vector<2x32xf32>
    %303 = arith.negf %302 : vector<2x32xf32>
    %304 = math.exp %303 : vector<2x32xf32>
    %cst_81 = arith.constant 1.000000e+00 : f32
    %305 = vector.broadcast %cst_81 : f32 to vector<2x32xf32>
    %306 = arith.addf %305, %304 : vector<2x32xf32>
    %307 = arith.divf %305, %306 : vector<2x32xf32>
    %308 = vector.extract_strided_slice %307 {offsets = [0, 0], sizes = [2, 8], strides = [1, 1]} : vector<2x32xf32> to vector<2x8xf32>
    %309 = vector.extract_strided_slice %307 {offsets = [0, 8], sizes = [2, 8], strides = [1, 1]} : vector<2x32xf32> to vector<2x8xf32>
    %310 = vector.extract_strided_slice %307 {offsets = [0, 16], sizes = [2, 8], strides = [1, 1]} : vector<2x32xf32> to vector<2x8xf32>
    %cst_82 = arith.constant 2.000000e+00 : f32
    %311 = vector.broadcast %cst_82 : f32 to vector<2x8xf32>
    %312 = arith.mulf %311, %310 : vector<2x8xf32>
    %cst_83 = arith.constant 1.000000e+00 : f32
    %313 = vector.broadcast %cst_83 : f32 to vector<2x8xf32>
    %314 = arith.subf %312, %313 : vector<2x8xf32>
    %315 = vector.extract_strided_slice %307 {offsets = [0, 24], sizes = [2, 8], strides = [1, 1]} : vector<2x32xf32> to vector<2x8xf32>
    %316 = arith.mulf %309, %298 : vector<2x8xf32>
    %317 = arith.mulf %308, %314 : vector<2x8xf32>
    %318 = arith.addf %316, %317 : vector<2x8xf32>
    %319 = math.tanh %318 : vector<2x8xf32>
    %320 = arith.mulf %315, %319 : vector<2x8xf32>
    %cst_84 = arith.constant dense<0.000000e+00> : vector<2x32xf32>
    %321 = tpu.matmul %320, %4, %cst_84 {dimension_numbers = #tpu.dot_dimension_numbers<[1], [0], [0], [1], [0, 0, 1, 1], [], []>} : vector<2x8xf32>, vector<8x32xf32>, vector<2x32xf32> -> vector<2x32xf32>
    %322 = arith.addf %198, %321 : vector<2x32xf32>
    %323 = arith.negf %322 : vector<2x32xf32>
    %324 = math.exp %323 : vector<2x32xf32>
    %cst_85 = arith.constant 1.000000e+00 : f32
    %325 = vector.broadcast %cst_85 : f32 to vector<2x32xf32>
    %326 = arith.addf %325, %324 : vector<2x32xf32>
    %327 = arith.divf %325, %326 : vector<2x32xf32>
    %328 = vector.extract_strided_slice %327 {offsets = [0, 0], sizes = [2, 8], strides = [1, 1]} : vector<2x32xf32> to vector<2x8xf32>
    %329 = vector.extract_strided_slice %327 {offsets = [0, 8], sizes = [2, 8], strides = [1, 1]} : vector<2x32xf32> to vector<2x8xf32>
    %330 = vector.extract_strided_slice %327 {offsets = [0, 16], sizes = [2, 8], strides = [1, 1]} : vector<2x32xf32> to vector<2x8xf32>
    %cst_86 = arith.constant 2.000000e+00 : f32
    %331 = vector.broadcast %cst_86 : f32 to vector<2x8xf32>
    %332 = arith.mulf %331, %330 : vector<2x8xf32>
    %cst_87 = arith.constant 1.000000e+00 : f32
    %333 = vector.broadcast %cst_87 : f32 to vector<2x8xf32>
    %334 = arith.subf %332, %333 : vector<2x8xf32>
    %335 = vector.extract_strided_slice %327 {offsets = [0, 24], sizes = [2, 8], strides = [1, 1]} : vector<2x32xf32> to vector<2x8xf32>
    %336 = arith.mulf %329, %318 : vector<2x8xf32>
    %337 = arith.mulf %328, %334 : vector<2x8xf32>
    %338 = arith.addf %336, %337 : vector<2x8xf32>
    %339 = math.tanh %338 : vector<2x8xf32>
    %340 = arith.mulf %335, %339 : vector<2x8xf32>
    %cst_88 = arith.constant dense<0.000000e+00> : vector<2x32xf32>
    %341 = tpu.matmul %340, %4, %cst_88 {dimension_numbers = #tpu.dot_dimension_numbers<[1], [0], [0], [1], [0, 0, 1, 1], [], []>} : vector<2x8xf32>, vector<8x32xf32>, vector<2x32xf32> -> vector<2x32xf32>
    %342 = arith.addf %198, %341 : vector<2x32xf32>
    %343 = arith.negf %342 : vector<2x32xf32>
    %344 = math.exp %343 : vector<2x32xf32>
    %cst_89 = arith.constant 1.000000e+00 : f32
    %345 = vector.broadcast %cst_89 : f32 to vector<2x32xf32>
    %346 = arith.addf %345, %344 : vector<2x32xf32>
    %347 = arith.divf %345, %346 : vector<2x32xf32>
    %348 = vector.extract_strided_slice %347 {offsets = [0, 0], sizes = [2, 8], strides = [1, 1]} : vector<2x32xf32> to vector<2x8xf32>
    %349 = vector.extract_strided_slice %347 {offsets = [0, 8], sizes = [2, 8], strides = [1, 1]} : vector<2x32xf32> to vector<2x8xf32>
    %350 = vector.extract_strided_slice %347 {offsets = [0, 16], sizes = [2, 8], strides = [1, 1]} : vector<2x32xf32> to vector<2x8xf32>
    %cst_90 = arith.constant 2.000000e+00 : f32
    %351 = vector.broadcast %cst_90 : f32 to vector<2x8xf32>
    %352 = arith.mulf %351, %350 : vector<2x8xf32>
    %cst_91 = arith.constant 1.000000e+00 : f32
    %353 = vector.broadcast %cst_91 : f32 to vector<2x8xf32>
    %354 = arith.subf %352, %353 : vector<2x8xf32>
    %355 = vector.extract_strided_slice %347 {offsets = [0, 24], sizes = [2, 8], strides = [1, 1]} : vector<2x32xf32> to vector<2x8xf32>
    %356 = arith.mulf %349, %338 : vector<2x8xf32>
    %357 = arith.mulf %348, %354 : vector<2x8xf32>
    %358 = arith.addf %356, %357 : vector<2x8xf32>
    %359 = math.tanh %358 : vector<2x8xf32>
    %360 = arith.mulf %355, %359 : vector<2x8xf32>
    %361 = tpu.concatenate %220, %240, %260, %280, %300, %320, %340, %360 in 1 : vector<2x8xf32>, vector<2x8xf32>, vector<2x8xf32>, vector<2x8xf32>, vector<2x8xf32>, vector<2x8xf32>, vector<2x8xf32>, vector<2x8xf32> -> vector<2x64xf32>
    %c0_92 = arith.constant 0 : index
    %c0_93 = arith.constant 0 : index
    %362 = vector.load %arg2[%c0_92, %c0_93] : memref<2x64xf32, #tpu.memory_space<vmem>>, vector<2x64xf32>
    tpu.vector_store %arg2[%c0_92, %c0_93], %361 {strides = array<i32>} : memref<2x64xf32, #tpu.memory_space<vmem>>, vector<2x64xf32>,
    return
  }
}

</mosaic_0001>

<bundles_post_ra>
// kernel: lstm_ae_forward.1
= control target key start
LH: loop header
LB: loop body
LE: loop exit
PB: predicated region body
PF: predicated region fallthrough
CT: control target
= control target key end

     0   :  { %vm38_vm0 = vcmask 1041409   ;;  %vm45_vm1 = vcmask 1043459   ;;  %vm52_vm2 = vcmask 1045509   ;;  %v2294_v1 = vmov 0.0|0.0   ;;  %s2297_s20 = smov 96   ;;  %s2298_s21 = smov 16   ;;  %s2611_s1 = inlined_call_operand.vmem [shape: f32[64,64], index: 1, kind: input, shape index: {}]   ;;  %s2612_s0 = inlined_call_operand.vmem [shape: f32[2,8,8], index: 0, kind: input, shape index: {}]   ;;  %s2613_s2 = inlined_call_operand.vmem [shape: f32[2,64], index: 2, kind: output, shape index: {}]  }
   0x1   :  { %v11_v0 = vld [vmem:[%s2611_s1] sm:$0xff]  ;;  %2159 = vmatprep.subr.bf16.mxu1 %v2294_v1  ;;  %v20_v3 = vld [vmem:[%s2612_s0 + $0x8] sm:$0x1]  ;;  %vm59_vm3 = vcmask 1047559   ;;  %v22_v5 = vld [vmem:[%s2612_s0 + $0x9] sm:$0x1] }
   0x2   :  { %v19_v2 = vld [vmem:[%s2612_s0] sm:$0x1]  ;;  %2051 = vmatprep.subr.mxu0 %v11_v0  ;;  %v21_v4 = vld [vmem:[%s2612_s0 + $0x1] sm:$0x1]  ;;  %v23_v6 = vld [vmem:[%s2612_s0 + $0x2] sm:$0x1] }
   0x3   :  { %2052 = vmatpush3.msra.mxu0 %v11_v0  ;;  %v24_v7 = vld [vmem:[%s2612_s0 + $0xa] sm:$0x1]  ;;  %v25_v8 = vld [vmem:[%s2612_s0 + $0x3] sm:$0x1]  ;;  %v26_v9 = vld [vmem:[%s2612_s0 + $0xb] sm:$0x1] }
   0x4   :  { %v37_v10 = vrot.slane %v20_v3, 7  ;;  %v43_v11 = vrot.slane %v21_v4, 6  ;;  %v44_v12 = vrot.slane %v22_v5, 5  ;;  %v50_v13 = vrot.slane %v23_v6, 4  ;;  %2162 = vmatprep.subr.bf16.mxu0 %v2294_v1  ;;  %v12_v17 = vld [vmem:[%s2611_s1 + $0x8] sm:$0xff]  ;;  %v13_v18 = vld [vmem:[%s2611_s1 + $0x10] sm:$0xff] }
   0x5   :  { %v51_v14 = vrot.slane %v24_v7, 3  ;;  %v57_v15 = vrot.slane %v25_v8, 2  ;;  %v58_v16 = vrot.slane %v26_v9, 1  ;;  %vm85_vm4 = vcmask 1041408   ;;  %v27_v21 = vld [vmem:[%s2612_s0 + $0x4] sm:$0x1] }
   0x6   :  { %v39_v19 = vsel %vm38_vm0, %v37_v10, %v19_v2  ;;  %v46_v20 = vsel %vm45_vm1, %v44_v12, %v43_v11  ;;  %vm87_vm5 = vcmask 1043456   ;;  %vm89_vm6 = vcmask 1045504   ;;  %v28_v22 = vld [vmem:[%s2612_s0 + $0xc] sm:$0x1]  ;;  %v29_v23 = vld [vmem:[%s2612_s0 + $0x5] sm:$0x1] }
   0x7   :  { %v53_v24 = vsel %vm52_vm2, %v51_v14, %v50_v13  ;;  %v60_v25 = vsel %vm59_vm3, %v58_v16, %v57_v15  ;;  %v86_v26 = vsel %vm85_vm4, %v39_v19, %v46_v20  ;;  %vm98_vm7 = vcmask 64512   ;;  %v30_v27 = vld [vmem:[%s2612_s0 + $0xd] sm:$0x1]  ;;  %v31_v28 = vld [vmem:[%s2612_s0 + $0x6] sm:$0x1]  ;;  %s2299_s22 = smov 32  }
   0x8   :  { %v88_v29 = vsel %vm87_vm5, %v86_v26, %v53_v24  ;;  %v2377_v30 = vpack.c.bf16 %v13_v18, %v12_v17  ;;  %v32_v31 = vld [vmem:[%s2612_s0 + $0xe] sm:$0x1]  ;;  %v33_v32 = vld [vmem:[%s2612_s0 + $0x7] sm:$0x1]  ;;  %v34_v33 = vld [vmem:[%s2612_s0 + $0xf] sm:$0x1] }
   0x9   :  { %v90_v34 = vsel %vm89_vm6, %v88_v29, %v60_v25  ;;  %v64_v35 = vrot.slane %v28_v22, 7  ;;  %v69_v36 = vrot.slane %v29_v23, 6  ;;  %v70_v37 = vrot.slane %v30_v27, 5  ;;  %v1954_v50 = vld [vmem:[%s2611_s1 + $0x18] ss:$0 sm:$0xff]  ;;  %s2300_s23 = smov 80  }
   0xa   :  { %2053 = vmatprep.mubr.msk.f32.mxu0 %vm98_vm7, %v90_v34  ;;  %2161 = vmatpush3.bf16.msra.mxu1 %v2377_v30  ;;  %v75_v38 = vrot.slane %v31_v28, 4  ;;  %v76_v39 = vrot.slane %v32_v31, 3  ;;  %v81_v40 = vrot.slane %v33_v32, 2  ;;  %v82_v41 = vrot.slane %v34_v33, 1  ;;  %s2301_s4 = smov 112   ;;  %s2303_s5 = smov 104  }
   0xb   :  { %v65_v42 = vsel %vm38_vm0, %v64_v35, %v27_v21  ;;  %v71_v43 = vsel %vm45_vm1, %v70_v37, %v69_v36  ;;  %2165 = vmatprep.subr.bf16.mxu1 %v2294_v1  ;;  %vm2295_vm8 = vmmov 0   ;;  %v2296_v47 = vmov 0.0   ;;  %s2304_s6 = smov 24   ;;  %s2305_s7 = smov 120  }
   0xc   :  { %v77_v44 = vsel %vm52_vm2, %v76_v39, %v75_v38  ;;  %v83_v45 = vsel %vm59_vm3, %v82_v41, %v81_v40  ;;  %v91_v46 = vsel %vm85_vm4, %v65_v42, %v71_v43  ;;  %2060 = vmatprep.mubr.msk.f32.mxu1 %vm2295_vm8, %v2296_v47  ;;  %vm180_vm9 = vcmask 130048  }
   0xd   :  { %v92_v48 = vsel %vm87_vm5, %v91_v46, %v77_v44  ;;  %2061 = vmatmul.mubr.f32.vlgmr.msra.gmra.mrb[0].mxu1 %v2296_v47  ;;  %vm1938_vm10 = vcmask 195584   ;;  %vm1940_vm11 = vcmask 261120   ;;  %vm1942_vm12 = vcmask 326656  }
   0xe   :  { %v93_v49 = vsel %vm89_vm6, %v92_v48, %v83_v45  ;;  %2167 = vmatpush3.bf16.msra.mxu1 %v2377_v30  ;;  %2074 = vmatprep.mubr.msk.f32.mxu1 %vm2295_vm8, %v2296_v47  ;;  %vm1944_vm13 = vcmask 392192   ;;  %vm1946_vm14 = vcmask 457728   ;;  %vm1948_vm15 = vcmask 517120  }
   0xf   :  { %2054 = vmatmul.mubr.msk.f32.vlgmr.msra.gmra.mrb[0].mxu0 %vm98_vm7, %v93_v49  ;;  %2171 = vmatprep.subr.bf16.mxu1 %v2294_v1 }
  0x10   :  { %2164 = vmatpush3.bf16.msra.mxu0 %v2377_v30  ;;  %2067 = vmatprep.mubr.msk.f32.mxu0 %vm2295_vm8, %v2296_v47 }
  0x11   :  { %2168 = vmatprep.subr.bf16.mxu0 %v2294_v1 }
  0xe0   :  { %v250_v51 = vpop.f32.mrb[0].mxu1 }
  0xe1   :  { %v2062_v52 = vpop.f32.mrb[1].mxu1 }
  0xe2   :  { %v2055_v53 = vpop.f32.mrb[0].mxu0 }
  0xe3   :  { %v2414_v54 = vadd.f32 %v2055_v53, %v1954_v50  ;;  %v171_v55 = vpop.f32.mrb[1].mxu0 }
  0xe4   :  { %v2416_v56 = vadd.f32 %v1954_v50, %v171_v55 }
  0xe6   :  { %v254_v57 = vadd.f32 %v250_v51, %v2416_v56 }
  0xe8   :  { %v1957_v58 = vmul.f32 -1.442695, %v254_v57 }
  0xea   :  { %2198 = vpow2.f32 %v1957_v58 }
  0xf4   :  { %v2199_v59 = vpop.eup %2198 }
  0xf5   :  { %v258_v60 = vadd.f32 1.0, %v2199_v59 }
  0xf7   :  { %2200 = vrcp.f32 %v258_v60 }
 0x101   :  { %v2201_v61 = vpop.eup %2200 }
 0x102   :  { %v261_v62 = vmul.f32 2.0, %v2201_v61  ;;  %v263_v3 = vmul.f32 0.0, %v2201_v61 }
 0x104   :  { %v1958_v63 = vadd.f32 -1.0, %v261_v62 }
 0x106   :  { %265 = vrot.lane.b32.xlu0 %v1958_v63, %s2297_s20 }
 0x178   :  { %v266_v0 = vpop.permute.xlu0 %265 }
 0x179   :  { %v268_v2 = vmul.f32 %v2201_v61, %v266_v0 }
 0x17b   :  { %270 = vrot.lane.b32.xlu0 %v268_v2, %s2298_s21 }
 0x1ed   :  { %v271_v4 = vpop.permute.xlu0 %270 }
 0x1ee   :  { %v273_v5 = vadd.f32 %v271_v4, %v263_v3 }
 0x1f0   :  { %2202 = vtanh.f32 %v273_v5  ;;  %v368_v22 = vrot.slane %v273_v5, 6 }
 0x1fa   :  { %v2203_v6 = vpop.eup %2202 }
 0x1fb   :  { %276 = vrot.lane.b32.xlu1 %v2203_v6, %s2299_s22 }
 0x26d   :  { %v277_v7 = vpop.permute.xlu1 %276 }
 0x26e   :  { %v279_v8 = vmul.f32 %v2201_v61, %v277_v7 }
 0x270   :  { %281 = vrot.lane.b32.xlu1 %v279_v8, %s2300_s23 }
 0x2e2   :  { %v282_v9 = vpop.permute.xlu1 %281 }
 0x2e3   :  { %2068 = vmatmul.mubr.msk.f32.vlgmr.msra.gmra.mrb[2].mxu0 %vm180_vm9, %v282_v9 }
 0x2e4   :  { %2170 = vmatpush3.bf16.msra.mxu0 %v2377_v30  ;;  %2081 = vmatprep.mubr.msk.f32.mxu0 %vm2295_vm8, %v2296_v47 }
 0x2e5   :  { %2174 = vmatprep.subr.bf16.mxu0 %v2294_v1 }
 0x3b6   :  { %v351_v10 = vpop.f32.mrb[2].mxu0 }
 0x3b7   :  { %v356_v11 = vrot.slane %v351_v10, 6  ;;  %v2069_v12 = vpop.f32.mrb[3].mxu0 }
 0x3b9   :  { %v358_v13 = vadd.f32 %v356_v11, %v2416_v56 }
 0x3bb   :  { %v1960_v14 = vmul.f32 -1.442695, %v358_v13 }
 0x3bd   :  { %2204 = vpow2.f32 %v1960_v14 }
 0x3c7   :  { %v2205_v15 = vpop.eup %2204 }
 0x3c8   :  { %v362_v16 = vadd.f32 1.0, %v2205_v15 }
 0x3ca   :  { %2206 = vrcp.f32 %v362_v16 }
 0x3d4   :  { %v2207_v17 = vpop.eup %2206 }
 0x3d5   :  { %v365_v18 = vmul.f32 2.0, %v2207_v17  ;;  %v370_v23 = vmul.f32 %v2207_v17, %v368_v22 }
 0x3d7   :  { %v1961_v19 = vadd.f32 -1.0, %v365_v18 }
 0x3d9   :  { %372 = vrot.lane.b32.xlu0 %v1961_v19, %s2297_s20 }
 0x44b   :  { %v373_v20 = vpop.permute.xlu0 %372 }
 0x44c   :  { %v375_v21 = vmul.f32 %v2207_v17, %v373_v20 }
 0x44e   :  { %377 = vrot.lane.b32.xlu1 %v375_v21, %s2298_s21 }
 0x4c0   :  { %v378_v24 = vpop.permute.xlu1 %377 }
 0x4c1   :  { %v380_v25 = vadd.f32 %v378_v24, %v370_v23 }
 0x4c3   :  { %2208 = vtanh.f32 %v380_v25  ;;  %v476_v44 = vrot.slane %v380_v25, 6 }
 0x4cd   :  { %v2209_v26 = vpop.eup %2208 }
 0x4ce   :  { %383 = vrot.lane.b32.xlu0 %v2209_v26, %s2299_s22 }
 0x540   :  { %v384_v27 = vpop.permute.xlu0 %383 }
 0x541   :  { %v386_v28 = vmul.f32 %v2207_v17, %v384_v27 }
 0x543   :  { %v388_v29 = vrot.slane %v386_v28, 2 }
 0x545   :  { %389 = vrot.lane.b32.xlu1 %v388_v29, %s2300_s23 }
 0x5b7   :  { %v390_v31 = vpop.permute.xlu1 %389 }
 0x5b8   :  { %2075 = vmatmul.mubr.msk.f32.vlgmr.msra.gmra.mrb[2].mxu1 %vm180_vm9, %v390_v31 }
 0x5b9   :  { %2173 = vmatpush3.bf16.msra.mxu1 %v2377_v30  ;;  %2088 = vmatprep.mubr.msk.f32.mxu1 %vm2295_vm8, %v2296_v47 }
 0x5ba   :  { %2177 = vmatprep.subr.bf16.mxu1 %v2294_v1 }
 0x68b   :  { %v459_v32 = vpop.f32.mrb[2].mxu1 }
 0x68c   :  { %v464_v33 = vrot.slane %v459_v32, 4  ;;  %v2076_v34 = vpop.f32.mrb[3].mxu1 }
 0x68e   :  { %v466_v35 = vadd.f32 %v464_v33, %v2416_v56 }
 0x690   :  { %v1963_v36 = vmul.f32 -1.442695, %v466_v35 }
 0x692   :  { %2210 = vpow2.f32 %v1963_v36 }
 0x69c   :  { %v2211_v37 = vpop.eup %2210 }
 0x69d   :  { %v470_v38 = vadd.f32 1.0, %v2211_v37 }
 0x69f   :  { %2212 = vrcp.f32 %v470_v38 }
 0x6a9   :  { %v2213_v39 = vpop.eup %2212 }
 0x6aa   :  { %v473_v40 = vmul.f32 2.0, %v2213_v39  ;;  %v478_v45 = vmul.f32 %v2213_v39, %v476_v44 }
 0x6ac   :  { %v1964_v41 = vadd.f32 -1.0, %v473_v40 }
 0x6ae   :  { %480 = vrot.lane.b32.xlu0 %v1964_v41, %s2297_s20 }
 0x720   :  { %v481_v42 = vpop.permute.xlu0 %480 }
 0x721   :  { %v483_v43 = vmul.f32 %v2213_v39, %v481_v42 }
 0x723   :  { %485 = vrot.lane.b32.xlu1 %v483_v43, %s2298_s21 }
 0x795   :  { %v486_v46 = vpop.permute.xlu1 %485 }
 0x796   :  { %v488_v48 = vadd.f32 %v486_v46, %v478_v45 }
 0x798   :  { %2214 = vtanh.f32 %v488_v48  ;;  %v584_v5 = vrot.slane %v488_v48, 6 }
 0x7a2   :  { %v2215_v49 = vpop.eup %2214 }
 0x7a3   :  { %491 = vrot.lane.b32.xlu0 %v2215_v49, %s2299_s22 }
 0x815   :  { %v492_v50 = vpop.permute.xlu0 %491 }
 0x816   :  { %v494_v51 = vmul.f32 %v2213_v39, %v492_v50 }
 0x818   :  { %v496_v52 = vrot.slane %v494_v51, 4 }
 0x81a   :  { %497 = vrot.lane.b32.xlu1 %v496_v52, %s2300_s23 }
 0x88c   :  { %v498_v53 = vpop.permute.xlu1 %497 }
 0x88d   :  { %2082 = vmatmul.mubr.msk.f32.vlgmr.msra.gmra.mrb[4].mxu0 %vm180_vm9, %v498_v53 }
 0x88e   :  { %2176 = vmatpush3.bf16.msra.mxu0 %v2377_v30  ;;  %2095 = vmatprep.mubr.msk.f32.mxu0 %vm2295_vm8, %v2296_v47 }
 0x88f   :  { %2180 = vmatprep.subr.bf16.mxu0 %v2294_v1 }
 0x960   :  { %v567_v55 = vpop.f32.mrb[4].mxu0 }
 0x961   :  { %v572_v57 = vrot.slane %v567_v55, 2  ;;  %v2083_v58 = vpop.f32.mrb[5].mxu0 }
 0x963   :  { %v574_v59 = vadd.f32 %v572_v57, %v2416_v56 }
 0x965   :  { %v1966_v60 = vmul.f32 -1.442695, %v574_v59 }
 0x967   :  { %2216 = vpow2.f32 %v1966_v60 }
 0x971   :  { %v2217_v61 = vpop.eup %2216 }
 0x972   :  { %v578_v62 = vadd.f32 1.0, %v2217_v61 }
 0x974   :  { %2218 = vrcp.f32 %v578_v62 }
 0x97e   :  { %v2219_v63 = vpop.eup %2218 }
 0x97f   :  { %v581_v0 = vmul.f32 2.0, %v2219_v63  ;;  %v586_v6 = vmul.f32 %v2219_v63, %v584_v5 }
 0x981   :  { %v1967_v2 = vadd.f32 -1.0, %v581_v0 }
 0x983   :  { %588 = vrot.lane.b32.xlu0 %v1967_v2, %s2297_s20 }
 0x9f5   :  { %v589_v3 = vpop.permute.xlu0 %588 }
 0x9f6   :  { %v591_v4 = vmul.f32 %v2219_v63, %v589_v3 }
 0x9f8   :  { %593 = vrot.lane.b32.xlu1 %v591_v4, %s2298_s21 }
 0xa6a   :  { %v594_v7 = vpop.permute.xlu1 %593 }
 0xa6b   :  { %v596_v8 = vadd.f32 %v594_v7, %v586_v6 }
 0xa6d   :  { %2220 = vtanh.f32 %v596_v8  ;;  %v689_v24 = vrot.slane %v596_v8, 6 }
 0xa77   :  { %v2221_v56 = vpop.eup %2220 }
 0xa78   :  { %599 = vrot.lane.b32.xlu0 %v2221_v56, %s2299_s22 }
 0xaea   :  { %v600_v9 = vpop.permute.xlu0 %599 }
 0xaeb   :  { %v602_v10 = vmul.f32 %v2219_v63, %v600_v9 }
 0xaed   :  { %v604_v11 = vrot.slane %v602_v10, 6 }
 0xaef   :  { %605 = vrot.lane.b32.xlu1 %v604_v11, %s2300_s23 }
 0xb61   :  { %v606_v12 = vpop.permute.xlu1 %605 }
 0xb62   :  { %2089 = vmatmul.mubr.msk.f32.vlgmr.msra.gmra.mrb[4].mxu1 %vm180_vm9, %v606_v12 }
 0xb63   :  { %2179 = vmatpush3.bf16.msra.mxu1 %v2377_v30  ;;  %2102 = vmatprep.mubr.msk.f32.mxu1 %vm2295_vm8, %v2296_v47 }
 0xb64   :  { %2183 = vmatprep.subr.bf16.mxu1 %v2294_v1 }
 0xc35   :  { %v675_v13 = vpop.f32.mrb[4].mxu1 }
 0xc36   :  { %v679_v14 = vadd.f32 %v675_v13, %v2414_v54  ;;  %v2090_v15 = vpop.f32.mrb[5].mxu1 }
 0xc38   :  { %v1969_v16 = vmul.f32 -1.442695, %v679_v14 }
 0xc3a   :  { %2222 = vpow2.f32 %v1969_v16 }
 0xc44   :  { %v2223_v17 = vpop.eup %2222 }
 0xc45   :  { %v683_v18 = vadd.f32 1.0, %v2223_v17 }
 0xc47   :  { %2224 = vrcp.f32 %v683_v18 }
 0xc51   :  { %v2225_v19 = vpop.eup %2224 }
 0xc52   :  { %v686_v20 = vmul.f32 2.0, %v2225_v19  ;;  %v691_v1 = vmul.f32 %v2225_v19, %v689_v24 }
 0xc54   :  { %v1970_v21 = vadd.f32 -1.0, %v686_v20 }
 0xc56   :  { %693 = vrot.lane.b32.xlu0 %v1970_v21, %s2297_s20 }
 0xcc8   :  { %v694_v22 = vpop.permute.xlu0 %693 }
 0xcc9   :  { %v696_v23 = vmul.f32 %v2225_v19, %v694_v22 }
 0xccb   :  { %698 = vrot.lane.b32.xlu1 %v696_v23, %s2298_s21 }
 0xd3d   :  { %v699_v25 = vpop.permute.xlu1 %698 }
 0xd3e   :  { %v701_v26 = vadd.f32 %v699_v25, %v691_v1 }
 0xd40   :  { %2226 = vtanh.f32 %v701_v26  ;;  %v796_v43 = vrot.slane %v701_v26, 6 }
 0xd4a   :  { %v2227_v27 = vpop.eup %2226 }
 0xd4b   :  { %704 = vrot.lane.b32.xlu0 %v2227_v27, %s2299_s22  ;;  %v16_v27 = vld [vmem:[%s2611_s1 + $0x28] sm:$0xff] }
 0xdbd   :  { %v705_v28 = vpop.permute.xlu0 %704 }
 0xdbe   :  { %v707_v29 = vmul.f32 %v2225_v19, %v705_v28  ;;  %v2496_v28 = vld [vmem:[%s2611_s1 + $0x30] sm:$0xff] }
 0xdc0   :  { %709 = vrot.lane.b32.xlu1 %v707_v29, %s2300_s23 }
 0xe32   :  { %v710_v31 = vpop.permute.xlu1 %709 }
 0xe33   :  { %2096 = vmatmul.mubr.msk.f32.vlgmr.msra.gmra.mrb[6].mxu0 %vm180_vm9, %v710_v31 }
 0xe34   :  { %2182 = vmatpush3.bf16.msra.mxu0 %v2377_v30  ;;  %2109 = vmatprep.mubr.msk.f32.mxu0 %vm2295_vm8, %v2296_v47 }
 0xe35   :  { %2119 = vmatprep.subr.mxu0 %v2296_v47 }
 0xf06   :  { %v779_v32 = vpop.f32.mrb[6].mxu0 }
 0xf07   :  { %v784_v33 = vrot.slane %v779_v32, 6  ;;  %v2097_v34 = vpop.f32.mrb[7].mxu0 }
 0xf09   :  { %v786_v35 = vadd.f32 %v784_v33, %v2414_v54 }
 0xf0b   :  { %v1972_v36 = vmul.f32 -1.442695, %v786_v35 }
 0xf0d   :  { %2228 = vpow2.f32 %v1972_v36 }
 0xf17   :  { %v2229_v37 = vpop.eup %2228 }
 0xf18   :  { %v790_v38 = vadd.f32 1.0, %v2229_v37 }
 0xf1a   :  { %2230 = vrcp.f32 %v790_v38  ;;  %v1980_v38 = vld [vmem:[%s2611_s1 + $0x38] ss:$0 sm:$0xff] }
 0xf24   :  { %v2231_v39 = vpop.eup %2230 }
 0xf25   :  { %v793_v40 = vmul.f32 2.0, %v2231_v39  ;;  %v798_v44 = vmul.f32 %v2231_v39, %v796_v43 }
 0xf27   :  { %v1973_v41 = vadd.f32 -1.0, %v793_v40 }
 0xf29   :  { %800 = vrot.lane.b32.xlu0 %v1973_v41, %s2297_s20 }
 0xf9b   :  { %v801_v30 = vpop.permute.xlu0 %800 }
 0xf9c   :  { %v803_v42 = vmul.f32 %v2231_v39, %v801_v30 }
 0xf9e   :  { %805 = vrot.lane.b32.xlu1 %v803_v42, %s2298_s21 }
0x1010   :  { %v806_v45 = vpop.permute.xlu1 %805 }
0x1011   :  { %v808_v46 = vadd.f32 %v806_v45, %v798_v44 }
0x1013   :  { %2232 = vtanh.f32 %v808_v46  ;;  %v904_v4 = vrot.slane %v808_v46, 6 }
0x101d   :  { %v2233_v48 = vpop.eup %2232 }
0x101e   :  { %811 = vrot.lane.b32.xlu0 %v2233_v48, %s2299_s22 }
0x1090   :  { %v812_v49 = vpop.permute.xlu0 %811 }
0x1091   :  { %v814_v50 = vmul.f32 %v2231_v39, %v812_v49 }
0x1093   :  { %v816_v51 = vrot.slane %v814_v50, 2 }
0x1095   :  { %817 = vrot.lane.b32.xlu1 %v816_v51, %s2300_s23 }
0x1107   :  { %v818_v52 = vpop.permute.xlu1 %817 }
0x1108   :  { %2103 = vmatmul.mubr.msk.f32.vlgmr.msra.gmra.mrb[6].mxu1 %vm180_vm9, %v818_v52 }
0x1109   :  { %2116 = vmatprep.mubr.msk.f32.mxu1 %vm2295_vm8, %v2296_v47 }
0x11db   :  { %v887_v53 = vpop.f32.mrb[6].mxu1 }
0x11dc   :  { %v892_v55 = vrot.slane %v887_v53, 4  ;;  %v2104_v57 = vpop.f32.mrb[7].mxu1 }
0x11de   :  { %v894_v58 = vadd.f32 %v892_v55, %v2414_v54 }
0x11e0   :  { %v1975_v59 = vmul.f32 -1.442695, %v894_v58 }
0x11e2   :  { %2234 = vpow2.f32 %v1975_v59 }
0x11ec   :  { %v2235_v60 = vpop.eup %2234 }
0x11ed   :  { %v898_v61 = vadd.f32 1.0, %v2235_v60 }
0x11ef   :  { %2236 = vrcp.f32 %v898_v61 }
0x11f9   :  { %v2237_v62 = vpop.eup %2236 }
0x11fa   :  { %v901_v63 = vmul.f32 2.0, %v2237_v62  ;;  %v906_v5 = vmul.f32 %v2237_v62, %v904_v4 }
0x11fc   :  { %v1976_v0 = vadd.f32 -1.0, %v901_v63 }
0x11fe   :  { %908 = vrot.lane.b32.xlu0 %v1976_v0, %s2297_s20 }
0x1270   :  { %v909_v2 = vpop.permute.xlu0 %908 }
0x1271   :  { %v911_v3 = vmul.f32 %v2237_v62, %v909_v2 }
0x1273   :  { %913 = vrot.lane.b32.xlu1 %v911_v3, %s2298_s21 }
0x12e5   :  { %v914_v6 = vpop.permute.xlu1 %913 }
0x12e6   :  { %v916_v7 = vadd.f32 %v914_v6, %v906_v5 }
0x12e8   :  { %2238 = vtanh.f32 %v916_v7  ;;  %v1012_v24 = vrot.slane %v916_v7, 6 }
0x12f2   :  { %v2239_v8 = vpop.eup %2238 }
0x12f3   :  { %919 = vrot.lane.b32.xlu0 %v2239_v8, %s2299_s22 }
0x1365   :  { %v920_v56 = vpop.permute.xlu0 %919 }
0x1366   :  { %v922_v9 = vmul.f32 %v2237_v62, %v920_v56 }
0x1368   :  { %v924_v10 = vrot.slane %v922_v9, 4 }
0x136a   :  { %925 = vrot.lane.b32.xlu1 %v924_v10, %s2300_s23 }
0x13dc   :  { %v926_v11 = vpop.permute.xlu1 %925 }
0x13dd   :  { %2110 = vmatmul.mubr.msk.f32.vlgmr.msra.gmra.mrb[8].mxu0 %vm180_vm9, %v926_v11 }
0x13de   :  { %2121 = vmatprep.mubr.msk.f32.mxu0 %vm2295_vm8, %v2296_v47  ;;  %2120 = vmatpush3.msra.mxu0 %v2496_v28 }
0x13df   :  { %2129 = vmatprep.subr.mxu0 %v2296_v47 }
0x13e1   :  { %2122 = vmatmul.mubr.f32.vlgmr.msra.gmra.mrb[10].mxu0 %v2296_v47 }
0x13e2   :  { %2130 = vmatpush3.msra.mxu0 %v2496_v28  ;;  %2131 = vmatprep.mubr.msk.f32.mxu0 %vm2295_vm8, %v2296_v47 }
0x13e3   :  { %2139 = vmatprep.subr.mxu0 %v2296_v47 }
0x14b0   :  { %v995_v12 = vpop.f32.mrb[8].mxu0 }
0x14b1   :  { %v1000_v13 = vrot.slane %v995_v12, 2  ;;  %v2111_v14 = vpop.f32.mrb[9].mxu0 }
0x14b3   :  { %v1002_v15 = vadd.f32 %v1000_v13, %v2414_v54  ;;  %v15_v54 = vld [vmem:[%s2611_s1 + $0x20] sm:$0xff]  ;;  %s2302_s1 = smov 8  }
0x14b4   :  { %v2184_v29 = vpack.c.bf16 %v16_v27, %v15_v54  ;;  %v1179_v36 = vpop.f32.mrb[10].mxu0 }
0x14b5   :  { %v1978_v16 = vmul.f32 -1.442695, %v1002_v15  ;;  %v2123_v37 = vpop.f32.mrb[11].mxu0 }
0x14b6   :  { %2185 = vmatpush3.bf16.msra.mxu1 %v2184_v29 }
0x14b7   :  { %2240 = vpow2.f32 %v1978_v16  ;;  %2124 = vmatprep.subr.mxu1 %v2296_v47 }
0x14c1   :  { %v2241_v17 = vpop.eup %2240 }
0x14c2   :  { %v1006_v18 = vadd.f32 1.0, %v2241_v17 }
0x14c4   :  { %2242 = vrcp.f32 %v1006_v18 }
0x14ce   :  { %v2243_v19 = vpop.eup %2242 }
0x14cf   :  { %v1009_v20 = vmul.f32 2.0, %v2243_v19  ;;  %v1014_v1 = vmul.f32 %v2243_v19, %v1012_v24 }
0x14d1   :  { %v1979_v21 = vadd.f32 -1.0, %v1009_v20 }
0x14d3   :  { %1016 = vrot.lane.b32.xlu0 %v1979_v21, %s2297_s20 }
0x1545   :  { %v1017_v22 = vpop.permute.xlu0 %1016 }
0x1546   :  { %v1019_v23 = vmul.f32 %v2243_v19, %v1017_v22 }
0x1548   :  { %1021 = vrot.lane.b32.xlu1 %v1019_v23, %s2298_s21 }
0x15ba   :  { %v1022_v25 = vpop.permute.xlu1 %1021 }
0x15bb   :  { %v1024_v26 = vadd.f32 %v1022_v25, %v1014_v1 }
0x15bd   :  { %2244 = vtanh.f32 %v1024_v26 }
0x15c7   :  { %v2245_v31 = vpop.eup %2244 }
0x15c8   :  { %1027 = vrot.lane.b32.xlu0 %v2245_v31, %s2299_s22 }
0x163a   :  { %v1028_v32 = vpop.permute.xlu0 %1027 }
0x163b   :  { %v1030_v33 = vmul.f32 %v2243_v19, %v1028_v32 }
0x163d   :  { %v1036_v34 = vrot.slane %v1030_v33, 6 }
0x163f   :  { %1037 = vrot.lane.b32.xlu1 %v1036_v34, %s2300_s23 }
0x16b1   :  { %v1038_v35 = vpop.permute.xlu1 %1037 }
0x16b2   :  { %2117 = vmatmul.mubr.msk.f32.vlgmr.msra.gmra.mrb[8].mxu1 %vm180_vm9, %v1038_v35 }
0x16b3   :  { %2125 = vmatpush3.msra.mxu1 %v2496_v28  ;;  %2126 = vmatprep.mubr.msk.f32.mxu1 %vm2295_vm8, %v2296_v47 }
0x16b4   :  { %2134 = vmatprep.subr.mxu1 %v2296_v47 }
0x1785   :  { %v1107_v39 = vpop.f32.mrb[8].mxu1 }
0x1786   :  { %v2516_v40 = vadd.f32 %v1980_v38, %v1107_v39  ;;  %v2118_v41 = vpop.f32.mrb[9].mxu1 }
0x1788   :  { %v1183_v30 = vadd.f32 %v1179_v36, %v2516_v40 }
0x178a   :  { %v1982_v42 = vmul.f32 -1.442695, %v1183_v30 }
0x178c   :  { %2246 = vpow2.f32 %v1982_v42 }
0x1796   :  { %v2247_v43 = vpop.eup %2246 }
0x1797   :  { %v1187_v44 = vadd.f32 1.0, %v2247_v43 }
0x1799   :  { %2248 = vrcp.f32 %v1187_v44 }
0x17a3   :  { %v2249_v45 = vpop.eup %2248 }
0x17a4   :  { %v1190_v46 = vmul.f32 2.0, %v2249_v45  ;;  %v1192_v51 = vmul.f32 0.0, %v2249_v45 }
0x17a6   :  { %v1983_v48 = vadd.f32 -1.0, %v1190_v46 }
0x17a8   :  { %1194 = vrot.lane.b32.xlu0 %v1983_v48, %s2301_s4 }
0x181a   :  { %v1195_v49 = vpop.permute.xlu0 %1194 }
0x181b   :  { %v1197_v50 = vmul.f32 %v2249_v45, %v1195_v49 }
0x181d   :  { %1199 = vrot.lane.b32.xlu1 %v1197_v50, %s2302_s1 }
0x188f   :  { %v1200_v52 = vpop.permute.xlu1 %1199 }
0x1890   :  { %v1202_v53 = vadd.f32 %v1200_v52, %v1192_v51 }
0x1892   :  { %2250 = vtanh.f32 %v1202_v53 }
0x189c   :  { %v2251_v55 = vpop.eup %2250 }
0x189d   :  { %1205 = vrot.lane.b32.xlu0 %v2251_v55, %s2298_s21 }
0x190f   :  { %v1206_v57 = vpop.permute.xlu0 %1205 }
0x1910   :  { %v1208_v58 = vmul.f32 %v2249_v45, %v1206_v57 }
0x1912   :  { %1210 = vrot.lane.b32.xlu1 %v1208_v58, %s2303_s5 }
0x1984   :  { %v2523_v59 = vpop.permute.xlu1 %1210 }
0x1985   :  { %2127 = vmatmul.mubr.msk.f32.vlgmr.msra.gmra.mrb[10].mxu1 %vm98_vm7, %v2523_v59 }
0x1986   :  { %2135 = vmatpush3.msra.mxu1 %v2496_v28  ;;  %2136 = vmatprep.mubr.msk.f32.mxu1 %vm2295_vm8, %v2296_v47 }
0x1987   :  { %2144 = vmatprep.subr.mxu1 %v2296_v47 }
0x1a58   :  { %v1280_v60 = vpop.f32.mrb[10].mxu1 }
0x1a59   :  { %v1284_v61 = vadd.f32 %v1280_v60, %v2516_v40  ;;  %v2128_v62 = vpop.f32.mrb[11].mxu1 }
0x1a5b   :  { %v1985_v63 = vmul.f32 -1.442695, %v1284_v61 }
0x1a5d   :  { %2252 = vpow2.f32 %v1985_v63 }
0x1a67   :  { %v2253_v0 = vpop.eup %2252 }
0x1a68   :  { %v1288_v2 = vadd.f32 1.0, %v2253_v0 }
0x1a6a   :  { %2254 = vrcp.f32 %v1288_v2 }
0x1a74   :  { %v2255_v3 = vpop.eup %2254 }
0x1a75   :  { %v1291_v4 = vmul.f32 2.0, %v2255_v3  ;;  %v1293_v8 = vmul.f32 %v2255_v3, %v1202_v53 }
0x1a77   :  { %v1986_v5 = vadd.f32 -1.0, %v1291_v4 }
0x1a79   :  { %1295 = vrot.lane.b32.xlu0 %v1986_v5, %s2301_s4 }
0x1aeb   :  { %v1296_v6 = vpop.permute.xlu0 %1295 }
0x1aec   :  { %v1298_v7 = vmul.f32 %v2255_v3, %v1296_v6 }
0x1aee   :  { %1300 = vrot.lane.b32.xlu1 %v1298_v7, %s2302_s1 }
0x1b60   :  { %v1301_v56 = vpop.permute.xlu1 %1300 }
0x1b61   :  { %v1303_v9 = vadd.f32 %v1301_v56, %v1293_v8 }
0x1b63   :  { %2256 = vtanh.f32 %v1303_v9 }
0x1b6d   :  { %v2257_v10 = vpop.eup %2256 }
0x1b6e   :  { %1306 = vrot.lane.b32.xlu0 %v2257_v10, %s2298_s21 }
0x1be0   :  { %v1307_v11 = vpop.permute.xlu0 %1306 }
0x1be1   :  { %v2535_v12 = vmul.f32 %v2255_v3, %v1307_v11 }
0x1be3   :  { %1311 = vrot.lane.b32.xlu1 %v2535_v12, %s2303_s5 }
0x1c55   :  { %v1312_v13 = vpop.permute.xlu1 %1311 }
0x1c56   :  { %2132 = vmatmul.mubr.msk.f32.vlgmr.msra.gmra.mrb[12].mxu0 %vm98_vm7, %v1312_v13 }
0x1c57   :  { %2140 = vmatpush3.msra.mxu0 %v2496_v28  ;;  %2141 = vmatprep.mubr.msk.f32.mxu0 %vm2295_vm8, %v2296_v47 }
0x1c58   :  { %2149 = vmatprep.subr.mxu0 %v2296_v47 }
0x1d29   :  { %v1381_v14 = vpop.f32.mrb[12].mxu0 }
0x1d2a   :  { %v1385_v15 = vadd.f32 %v1381_v14, %v2516_v40  ;;  %v2133_v16 = vpop.f32.mrb[13].mxu0 }
0x1d2c   :  { %v1988_v17 = vmul.f32 -1.442695, %v1385_v15 }
0x1d2e   :  { %2258 = vpow2.f32 %v1988_v17 }
0x1d38   :  { %v2259_v18 = vpop.eup %2258 }
0x1d39   :  { %v1389_v19 = vadd.f32 1.0, %v2259_v18 }
0x1d3b   :  { %2260 = vrcp.f32 %v1389_v19 }
0x1d45   :  { %v2261_v20 = vpop.eup %2260 }
0x1d46   :  { %v1392_v21 = vmul.f32 2.0, %v2261_v20  ;;  %v1394_v1 = vmul.f32 %v2261_v20, %v1303_v9 }
0x1d48   :  { %v1989_v22 = vadd.f32 -1.0, %v1392_v21 }
0x1d4a   :  { %1396 = vrot.lane.b32.xlu0 %v1989_v22, %s2301_s4 }
0x1dbc   :  { %v1397_v23 = vpop.permute.xlu0 %1396 }
0x1dbd   :  { %v1399_v24 = vmul.f32 %v2261_v20, %v1397_v23 }
0x1dbf   :  { %1401 = vrot.lane.b32.xlu1 %v1399_v24, %s2302_s1 }
0x1e31   :  { %v1402_v25 = vpop.permute.xlu1 %1401 }
0x1e32   :  { %v1404_v26 = vadd.f32 %v1402_v25, %v1394_v1 }
0x1e34   :  { %2262 = vtanh.f32 %v1404_v26 }
0x1e3e   :  { %v2263_v54 = vpop.eup %2262 }
0x1e3f   :  { %1407 = vrot.lane.b32.xlu0 %v2263_v54, %s2298_s21 }
0x1eb1   :  { %v1408_v27 = vpop.permute.xlu0 %1407 }
0x1eb2   :  { %v2548_v29 = vmul.f32 %v2261_v20, %v1408_v27 }
0x1eb4   :  { %1412 = vrot.lane.b32.xlu1 %v2548_v29, %s2303_s5 }
0x1f26   :  { %v1413_v31 = vpop.permute.xlu1 %1412 }
0x1f27   :  { %2137 = vmatmul.mubr.msk.f32.vlgmr.msra.gmra.mrb[12].mxu1 %vm98_vm7, %v1413_v31 }
0x1f28   :  { %2145 = vmatpush3.msra.mxu1 %v2496_v28  ;;  %2146 = vmatprep.mubr.msk.f32.mxu1 %vm2295_vm8, %v2296_v47 }
0x1f29   :  { %2154 = vmatprep.subr.mxu1 %v2296_v47 }
0x1ffa   :  { %v1482_v32 = vpop.f32.mrb[12].mxu1 }
0x1ffb   :  { %v1486_v33 = vadd.f32 %v1482_v32, %v2516_v40  ;;  %v2138_v34 = vpop.f32.mrb[13].mxu1 }
0x1ffd   :  { %v1991_v35 = vmul.f32 -1.442695, %v1486_v33 }
0x1fff   :  { %2264 = vpow2.f32 %v1991_v35 }
0x2009   :  { %v2265_v36 = vpop.eup %2264 }
0x200a   :  { %v1490_v37 = vadd.f32 1.0, %v2265_v36 }
0x200c   :  { %2266 = vrcp.f32 %v1490_v37 }
0x2016   :  { %v2267_v38 = vpop.eup %2266 }
0x2017   :  { %v1493_v39 = vmul.f32 2.0, %v2267_v38  ;;  %v1495_v43 = vmul.f32 %v2267_v38, %v1404_v26 }
0x2019   :  { %v1992_v41 = vadd.f32 -1.0, %v1493_v39 }
0x201b   :  { %1497 = vrot.lane.b32.xlu0 %v1992_v41, %s2301_s4 }
0x208d   :  { %v1498_v30 = vpop.permute.xlu0 %1497 }
0x208e   :  { %v1500_v42 = vmul.f32 %v2267_v38, %v1498_v30 }
0x2090   :  { %1502 = vrot.lane.b32.xlu1 %v1500_v42, %s2302_s1 }
0x2102   :  { %v1503_v44 = vpop.permute.xlu1 %1502 }
0x2103   :  { %v1505_v45 = vadd.f32 %v1503_v44, %v1495_v43 }
0x2105   :  { %2268 = vtanh.f32 %v1505_v45 }
0x210f   :  { %v2269_v46 = vpop.eup %2268 }
0x2110   :  { %1508 = vrot.lane.b32.xlu0 %v2269_v46, %s2298_s21 }
0x2182   :  { %v1509_v48 = vpop.permute.xlu0 %1508 }
0x2183   :  { %v2561_v49 = vmul.f32 %v2267_v38, %v1509_v48 }
0x2185   :  { %1513 = vrot.lane.b32.xlu1 %v2561_v49, %s2303_s5 }
0x21f7   :  { %v1514_v50 = vpop.permute.xlu1 %1513 }
0x21f8   :  { %2142 = vmatmul.mubr.msk.f32.vlgmr.msra.gmra.mrb[14].mxu0 %vm98_vm7, %v1514_v50 }
0x21f9   :  { %2150 = vmatpush3.msra.mxu0 %v2496_v28  ;;  %2151 = vmatprep.mubr.msk.f32.mxu0 %vm2295_vm8, %v2296_v47 }
0x22cb   :  { %v1583_v51 = vpop.f32.mrb[14].mxu0 }
0x22cc   :  { %v1587_v52 = vadd.f32 %v1583_v51, %v2516_v40  ;;  %v2143_v53 = vpop.f32.mrb[15].mxu0 }
0x22ce   :  { %v1994_v55 = vmul.f32 -1.442695, %v1587_v52 }
0x22d0   :  { %2270 = vpow2.f32 %v1994_v55 }
0x22da   :  { %v2271_v57 = vpop.eup %2270 }
0x22db   :  { %v1591_v58 = vadd.f32 1.0, %v2271_v57 }
0x22dd   :  { %2272 = vrcp.f32 %v1591_v58 }
0x22e7   :  { %v2273_v60 = vpop.eup %2272 }
0x22e8   :  { %v1594_v61 = vmul.f32 2.0, %v2273_v60  ;;  %v1596_v2 = vmul.f32 %v2273_v60, %v1505_v45 }
0x22ea   :  { %v1995_v62 = vadd.f32 -1.0, %v1594_v61 }
0x22ec   :  { %1598 = vrot.lane.b32.xlu0 %v1995_v62, %s2301_s4 }
0x235e   :  { %v1599_v63 = vpop.permute.xlu0 %1598 }
0x235f   :  { %v1601_v0 = vmul.f32 %v2273_v60, %v1599_v63 }
0x2361   :  { %1603 = vrot.lane.b32.xlu1 %v1601_v0, %s2302_s1 }
0x23d3   :  { %v1604_v3 = vpop.permute.xlu1 %1603 }
0x23d4   :  { %v1606_v4 = vadd.f32 %v1604_v3, %v1596_v2 }
0x23d6   :  { %2274 = vtanh.f32 %v1606_v4 }
0x23e0   :  { %v2275_v5 = vpop.eup %2274 }
0x23e1   :  { %1609 = vrot.lane.b32.xlu0 %v2275_v5, %s2298_s21 }
0x2453   :  { %v1610_v6 = vpop.permute.xlu0 %1609 }
0x2454   :  { %v2573_v7 = vmul.f32 %v2273_v60, %v1610_v6 }
0x2456   :  { %1614 = vrot.lane.b32.xlu1 %v2573_v7, %s2303_s5 }
0x24c8   :  { %v1615_v8 = vpop.permute.xlu1 %1614 }
0x24c9   :  { %2147 = vmatmul.mubr.msk.f32.vlgmr.msra.gmra.mrb[14].mxu1 %vm98_vm7, %v1615_v8 }
0x24ca   :  { %2155 = vmatpush3.msra.mxu1 %v2496_v28  ;;  %2156 = vmatprep.mubr.msk.f32.mxu1 %vm2295_vm8, %v2296_v47 }
0x259c   :  { %v1684_v56 = vpop.f32.mrb[14].mxu1 }
0x259d   :  { %v1688_v9 = vadd.f32 %v1684_v56, %v2516_v40  ;;  %v2148_v10 = vpop.f32.mrb[15].mxu1 }
0x259f   :  { %v1997_v11 = vmul.f32 -1.442695, %v1688_v9 }
0x25a1   :  { %2276 = vpow2.f32 %v1997_v11 }
0x25ab   :  { %v2277_v13 = vpop.eup %2276 }
0x25ac   :  { %v1692_v14 = vadd.f32 1.0, %v2277_v13 }
0x25ae   :  { %2278 = vrcp.f32 %v1692_v14 }
0x25b8   :  { %v2279_v15 = vpop.eup %2278 }
0x25b9   :  { %v1695_v16 = vmul.f32 2.0, %v2279_v15  ;;  %v1697_v28 = vmul.f32 %v2279_v15, %v1606_v4 }
0x25bb   :  { %v1998_v17 = vadd.f32 -1.0, %v1695_v16 }
0x25bd   :  { %1699 = vrot.lane.b32.xlu0 %v1998_v17, %s2301_s4 }
0x262f   :  { %v1700_v18 = vpop.permute.xlu0 %1699 }
0x2630   :  { %v1702_v19 = vmul.f32 %v2279_v15, %v1700_v18 }
0x2632   :  { %1704 = vrot.lane.b32.xlu1 %v1702_v19, %s2302_s1 }
0x26a4   :  { %v1705_v47 = vpop.permute.xlu1 %1704 }
0x26a5   :  { %v1707_v20 = vadd.f32 %v1705_v47, %v1697_v28 }
0x26a7   :  { %2280 = vtanh.f32 %v1707_v20 }
0x26b1   :  { %v2281_v21 = vpop.eup %2280 }
0x26b2   :  { %1710 = vrot.lane.b32.xlu0 %v2281_v21, %s2298_s21 }
0x2724   :  { %v1711_v22 = vpop.permute.xlu0 %1710 }
0x2725   :  { %v1713_v23 = vmul.f32 %v2279_v15, %v1711_v22 }
0x2727   :  { %1715 = vrot.lane.b32.xlu1 %v1713_v23, %s2303_s5 }
0x2799   :  { %v1716_v24 = vpop.permute.xlu1 %1715 }
0x279a   :  { %2152 = vmatmul.mubr.msk.f32.vlgmr.msra.gmra.mrb[16].mxu0 %vm98_vm7, %v1716_v24 }
0x286d   :  { %v1785_v1 = vpop.f32.mrb[16].mxu0 }
0x286e   :  { %v1789_v25 = vadd.f32 %v1785_v1, %v2516_v40  ;;  %v2153_v26 = vpop.f32.mrb[17].mxu0 }
0x2870   :  { %v2000_v54 = vmul.f32 -1.442695, %v1789_v25 }
0x2872   :  { %2282 = vpow2.f32 %v2000_v54 }
0x287c   :  { %v2283_v27 = vpop.eup %2282 }
0x287d   :  { %v1793_v31 = vadd.f32 1.0, %v2283_v27 }
0x287f   :  { %2284 = vrcp.f32 %v1793_v31 }
0x2889   :  { %v2285_v32 = vpop.eup %2284 }
0x288a   :  { %v1796_v33 = vmul.f32 2.0, %v2285_v32  ;;  %v1798_v37 = vmul.f32 %v2285_v32, %v1707_v20 }
0x288c   :  { %v2001_v34 = vadd.f32 -1.0, %v1796_v33 }
0x288e   :  { %1800 = vrot.lane.b32.xlu0 %v2001_v34, %s2301_s4 }
0x2900   :  { %v1801_v35 = vpop.permute.xlu0 %1800 }
0x2901   :  { %v1803_v36 = vmul.f32 %v2285_v32, %v1801_v35 }
0x2903   :  { %1805 = vrot.lane.b32.xlu1 %v1803_v36, %s2302_s1 }
0x2975   :  { %v1806_v38 = vpop.permute.xlu1 %1805 }
0x2976   :  { %v1808_v39 = vadd.f32 %v1806_v38, %v1798_v37 }
0x2978   :  { %2286 = vtanh.f32 %v1808_v39 }
0x2982   :  { %v2287_v41 = vpop.eup %2286 }
0x2983   :  { %1811 = vrot.lane.b32.xlu0 %v2287_v41, %s2298_s21 }
0x29f5   :  { %v1812_v30 = vpop.permute.xlu0 %1811 }
0x29f6   :  { %v1814_v42 = vmul.f32 %v2285_v32, %v1812_v30 }
0x29f8   :  { %1816 = vrot.lane.b32.xlu1 %v1814_v42, %s2303_s5 }
0x2a6a   :  { %v1817_v43 = vpop.permute.xlu1 %1816 }
0x2a6b   :  { %2157 = vmatmul.mubr.msk.f32.vlgmr.msra.gmra.mrb[16].mxu1 %vm98_vm7, %v1817_v43 }
0x2b3e   :  { %v1886_v44 = vpop.f32.mrb[16].mxu1 }
0x2b3f   :  { %v1890_v45 = vadd.f32 %v1886_v44, %v2516_v40  ;;  %v2158_v46 = vpop.f32.mrb[17].mxu1 }
0x2b41   :  { %v2003_v48 = vmul.f32 -1.442695, %v1890_v45 }
0x2b43   :  { %2288 = vpow2.f32 %v2003_v48 }
0x2b4d   :  { %v2289_v50 = vpop.eup %2288 }
0x2b4e   :  { %v1894_v51 = vadd.f32 1.0, %v2289_v50 }
0x2b50   :  { %2290 = vrcp.f32 %v1894_v51 }
0x2b5a   :  { %v2291_v52 = vpop.eup %2290 }
0x2b5b   :  { %v1897_v53 = vmul.f32 2.0, %v2291_v52  ;;  %v1899_v40 = vmul.f32 %v2291_v52, %v1808_v39 }
0x2b5d   :  { %v2004_v55 = vadd.f32 -1.0, %v1897_v53 }
0x2b5f   :  { %1901 = vrot.lane.b32.xlu0 %v2004_v55, %s2301_s4 }
0x2bd1   :  { %v1902_v57 = vpop.permute.xlu0 %1901 }
0x2bd2   :  { %v1904_v58 = vmul.f32 %v2291_v52, %v1902_v57 }
0x2bd4   :  { %1906 = vrot.lane.b32.xlu1 %v1904_v58, %s2302_s1 }
0x2bd8   :  { %1917 = vrot.lane.b32.xlu1 %v2535_v12, %s2301_s4 }
0x2bdc   :  { %1923 = vrot.lane.b32.xlu1 %v2573_v7, %s2302_s1 }
0x2be0   :  { %1929 = vrot.lane.b32.xlu1 %v1814_v42, %s2304_s6 }
0x2c46   :  { %v1907_v60 = vpop.permute.xlu1 %1906 }
0x2c47   :  { %v1909_v61 = vadd.f32 %v1907_v60, %v1899_v40 }
0x2c49   :  { %2292 = vtanh.f32 %v1909_v61 }
0x2c4a   :  { %v1918_v12 = vpop.permute.xlu1 %1917 }
0x2c4b   :  { %v1936_v3 = vsel %vm98_vm7, %v2523_v59, %v1918_v12 }
0x2c4e   :  { %v1924_v6 = vpop.permute.xlu1 %1923 }
0x2c52   :  { %v1930_v56 = vpop.permute.xlu1 %1929 }
0x2c53   :  { %v2293_v62 = vpop.eup %2292 }
0x2c54   :  { %1912 = vrot.lane.b32.xlu0 %v2293_v62, %s2298_s21 }
0x2c58   :  { %1920 = vrot.lane.b32.xlu0 %v2548_v29, %s2305_s7 }
0x2c5c   :  { %1926 = vrot.lane.b32.xlu0 %v1713_v23, %s2298_s21 }
0x2cc6   :  { %v1913_v63 = vpop.permute.xlu0 %1912 }
0x2cc7   :  { %v1915_v0 = vmul.f32 %v2291_v52, %v1913_v63 }
0x2cc9   :  { %1933 = vrot.lane.b32.xlu0 %v1915_v0, %s2299_s22 }
0x2cca   :  { %v1921_v2 = vpop.permute.xlu0 %1920 }
0x2ccb   :  { %v1937_v4 = vsel %vm180_vm9, %v1936_v3, %v1921_v2 }
0x2ccc   :  { %v1939_v5 = vsel %vm1938_vm10, %v1937_v4, %v2561_v49 }
0x2ccd   :  { %v1941_v7 = vsel %vm1940_vm11, %v1939_v5, %v1924_v6 }
0x2cce   :  { %v1927_v29 = vpop.permute.xlu0 %1926 }
0x2ccf   :  { %v1943_v8 = vsel %vm1942_vm12, %v1941_v7, %v1927_v29 }
0x2cd0   :  { %v1945_v10 = vsel %vm1944_vm13, %v1943_v8, %v1930_v56 }
0x2d3b   :  { %v1934_v9 = vpop.permute.xlu0 %1933 }
0x2d3c   :  { %v1947_v11 = vsel %vm1946_vm14, %v1945_v10, %v1934_v9 }
0x2d3d   :  { %1949 = vst.msk [vmem:[%s2613_s2] sm:$0x3] %vm1948_vm15, %v1947_v11 }

</bundles_post_ra>
